<compile_context>
chip_gen: v7x
topology: tpu7x:2x2x1
jax: 0.10.0
libtpu: 0.0.40
codegen_flags: <defaults>
</compile_context>

<pallas_src>
import functools

import jax
import jax.numpy as jnp
from jax.experimental import pallas as pl
from jax.experimental.pallas import tpu as pltpu


# ----------------------------------------------------------------------------------
# generic helpers
# ----------------------------------------------------------------------------------
def _round_up(x, m):
    return (x + m - 1) // m * m


# ----------------------------------------------------------------------------------
# fused matmul kernel:  out = act( (A_bf16 @ W_bf16) + bias [+ residual] )
# (BN scale is pre-folded into W; accumulation stays f32 on the MXU.)
# ----------------------------------------------------------------------------------
def _make_mm_kernel(has_res, relu):
    def kernel(a_ref, w_ref, b_ref, *rest):
        if has_res:
            r_ref, o_ref, acc_ref = rest
        else:
            o_ref, acc_ref = rest

        @pl.when(pl.program_id(1) == 0)
        def _():
            acc_ref[...] = jnp.zeros_like(acc_ref)

        acc_ref[...] += jnp.dot(a_ref[...], w_ref[...],
                                preferred_element_type=jnp.float32)

        @pl.when(pl.program_id(1) == pl.num_programs(1) - 1)
        def _():
            y = acc_ref[...] + b_ref[...]
            if has_res:
                y = y + r_ref[...]
            if relu:
                y = jnp.maximum(y, 0.0)
            o_ref[...] = y.astype(o_ref.dtype)

    return kernel


@functools.lru_cache(maxsize=None)
def _build_fused_matmul(M_pad, K_pad, N_pad, tm, tk, has_res, relu):
    grid = (M_pad // tm, K_pad // tk)
    in_specs = [
        pl.BlockSpec((tm, tk), lambda i, k: (i, k)),        # A (bf16)
        pl.BlockSpec((tk, N_pad), lambda i, k: (k, 0)),     # W (bf16, scale folded)
        pl.BlockSpec((1, N_pad), lambda i, k: (0, 0)),      # bias/shift (f32)
    ]
    if has_res:
        in_specs.append(pl.BlockSpec((tm, N_pad), lambda i, k: (i, 0)))  # residual f32

    f = pl.pallas_call(
        _make_mm_kernel(has_res, relu),
        out_shape=jax.ShapeDtypeStruct((M_pad, N_pad), jnp.float32),
        grid_spec=pltpu.PrefetchScalarGridSpec(
            num_scalar_prefetch=0,
            grid=grid,
            in_specs=in_specs,
            out_specs=pl.BlockSpec((tm, N_pad), lambda i, k: (i, 0)),
            scratch_shapes=[pltpu.VMEM((tm, N_pad), jnp.float32)],
        ),
        compiler_params=pltpu.CompilerParams(
            dimension_semantics=("parallel", "arbitrary"),
            vmem_limit_bytes=48 * 1024 * 1024),
    )
    return jax.jit(f)


def _pick_tk(K_pad):
    """Adaptive K tile: single step for small K, otherwise a divisor of K_pad."""
    if K_pad <= 1024:
        return K_pad
    for cand in (1024, 768, 512, 384, 256):
        if K_pad % cand == 0:
            return cand
    return 128


def fused_matmul(a, w, bias, residual=None, relu=True):
    """a:[M,K]  w:[K,N]  bias:[N]  residual:[M,N]|None -> [M,N] float32."""
    M, K = a.shape
    N = w.shape[1]

    K_pad = _round_up(K, 128)
    tk = _pick_tk(K_pad)
    N_pad = _round_up(N, 128)
    # Bigger M tiles for the HBM-bound decoder layers; keep footprint bounded
    # (<= ~4 MiB of A/out/acc) so it also fits v7x's 64 MiB VMEM comfortably.
    tm_cap = 1024 if N_pad <= 256 else 512
    tm = min(tm_cap, _round_up(M, 8))
    M_pad = _round_up(M, tm)

    a_p = jnp.pad(a.astype(jnp.bfloat16), ((0, M_pad - M), (0, K_pad - K)))
    w_p = jnp.pad(w.astype(jnp.bfloat16), ((0, K_pad - K), (0, N_pad - N)))
    b_p = jnp.pad(bias.astype(jnp.float32).reshape(1, N), ((0, 0), (0, N_pad - N)))
    args = [a_p, w_p, b_p]
    if residual is not None:
        r_p = jnp.pad(residual.astype(jnp.float32),
                      ((0, M_pad - M), (0, N_pad - N)))
        args.append(r_p)

    f = _build_fused_matmul(M_pad, K_pad, N_pad, tm, tk,
                            residual is not None, relu)
    out = f(*args)
    if M_pad != M or N_pad != N:
        out = out[:M, :N]
    return out


# ----------------------------------------------------------------------------------
# conv2d = im2col (bf16, minimal padding) + fused Pallas matmul
# ----------------------------------------------------------------------------------
# TODO(synk): fully fuse the im2col patch gather into the matmul kernel via manual DMA
# (halo reads); the KH*KW shifted copies are still materialized (in bf16) by XLA glue.
def conv2d(x, w, scale, bias, stride=1, padding=1, relu=True, residual=None):
    """x:[N,H,W,Cin] NHWC f32; w:[Cout,Cin,KH,KW] (PyTorch layout)."""
    N, H, W_, Cin = x.shape
    Cout, _, KH, KW = w.shape
    OH = (H + 2 * padding - KH) // stride + 1
    OW = (W_ + 2 * padding - KW) // stride + 1

    xb = x.astype(jnp.bfloat16)
    xp = jnp.pad(xb, ((0, 0), (padding, padding), (padding, padding), (0, 0)))

    patches = []
    for kh in range(KH):
        for kw in range(KW):
            patches.append(xp[:, kh:kh + stride * (OH - 1) + 1:stride,
                              kw:kw + stride * (OW - 1) + 1:stride, :])
    if len(patches) == 1:
        a = patches[0].reshape(N * OH * OW, Cin)
    else:
        a = jnp.stack(patches, axis=3).reshape(N * OH * OW, KH * KW * Cin)

    wk = jnp.transpose(w, (2, 3, 1, 0)).reshape(KH * KW * Cin, Cout)
    wk = wk * scale[None, :]                      # fold BN scale into the weights

    res = None if residual is None else residual.reshape(N * OH * OW, Cout)
    out = fused_matmul(a, wk, bias, res, relu)
    return out.reshape(N, OH, OW, Cout)


# ----------------------------------------------------------------------------------
# 2x2 max-pool (stride 2): single-pass Pallas kernel, parallel over batch.
# The JAX-side reshape (N,H,W,C)->(N,OH,2,OW,2C) is a free row-major relayout.
# ----------------------------------------------------------------------------------
def _maxpool_kernel(x_ref, o_ref):
    # x_ref: (1, OH, 2, OW, 2C)   o_ref: (1, OH, OW, C)
    C = o_ref.shape[-1]
    a = jnp.maximum(x_ref[0, :, 0, :, :], x_ref[0, :, 1, :, :])   # max over rows
    o_ref[0, :, :, :] = jnp.maximum(a[..., :C], a[..., C:])       # max over cols


@functools.lru_cache(maxsize=None)
def _build_maxpool(N, OH, OW, C):
    f = pl.pallas_call(
        _maxpool_kernel,
        out_shape=jax.ShapeDtypeStruct((N, OH, OW, C), jnp.float32),
        grid_spec=pltpu.PrefetchScalarGridSpec(
            num_scalar_prefetch=0, grid=(N,),
            in_specs=[pl.BlockSpec((1, OH, 2, OW, 2 * C),
                                   lambda n: (n, 0, 0, 0, 0))],
            out_specs=pl.BlockSpec((1, OH, OW, C), lambda n: (n, 0, 0, 0))),
        compiler_params=pltpu.CompilerParams(dimension_semantics=("parallel",)),
    )
    return jax.jit(f)


def maxpool2x2(x):
    N, H, W_, C = x.shape
    OH, OW = H // 2, W_ // 2
    xr = x.reshape(N, OH, 2, OW, 2 * C)          # contiguous, free
    return _build_maxpool(N, OH, OW, C)(xr)


# ----------------------------------------------------------------------------------
# bilinear 2x upsample (align_corners=False): phase-based single-pass Pallas kernel.
# For exact 2x the per-phase weights are the constant 0.25/0.75 pattern (edge
# replication reproduces PyTorch's source-index clamp exactly).  The kernel writes
# a (N,H,2,W,2C) phase layout; the final reshape to (N,2H,2W,C) is free.
# ----------------------------------------------------------------------------------
def _upsample_kernel(x_ref, o_ref):
    # x_ref: (1, H, W, C)   o_ref: (1, H, 2, W, 2C)
    x = x_ref[0, :, :, :]
    H, W_, C = x.shape

    if H > 1:
        xu = jnp.concatenate([x[:1], x[:-1]], axis=0)     # row above (edge replicate)
        xd = jnp.concatenate([x[1:], x[-1:]], axis=0)     # row below
    else:
        xu, xd = x, x
    r0 = 0.25 * xu + 0.75 * x                             # even output rows
    r1 = 0.75 * x + 0.25 * xd                             # odd output rows

    for pr, r in ((0, r0), (1, r1)):
        if W_ > 1:
            rl = jnp.concatenate([r[:, :1], r[:, :-1]], axis=1)   # left neighbor
            rr = jnp.concatenate([r[:, 1:], r[:, -1:]], axis=1)   # right neighbor
        else:
            rl, rr = r, r
        even_cols = 0.25 * rl + 0.75 * r
        odd_cols = 0.75 * r + 0.25 * rr
        o_ref[0, :, pr, :, 0:C] = even_cols
        o_ref[0, :, pr, :, C:2 * C] = odd_cols


@functools.lru_cache(maxsize=None)
def _build_upsample(N, H, W_, C):
    f = pl.pallas_call(
        _upsample_kernel,
        out_shape=jax.ShapeDtypeStruct((N, H, 2, W_, 2 * C), jnp.float32),
        grid_spec=pltpu.PrefetchScalarGridSpec(
            num_scalar_prefetch=0, grid=(N,),
            in_specs=[pl.BlockSpec((1, H, W_, C), lambda n: (n, 0, 0, 0))],
            out_specs=pl.BlockSpec((1, H, 2, W_, 2 * C),
                                   lambda n: (n, 0, 0, 0, 0))),
        compiler_params=pltpu.CompilerParams(dimension_semantics=("parallel",)),
    )
    return jax.jit(f)


def upsample2x_bilinear(x):
    """nn.Upsample(scale_factor=2, mode='bilinear', align_corners=False)."""
    N, H, W_, C = x.shape
    out5 = _build_upsample(N, H, W_, C)(x)       # (N, H, 2, W, 2C)
    return out5.reshape(N, 2 * H, 2 * W_, C)     # contiguous merge, free


# ----------------------------------------------------------------------------------
# deterministic parameter generation (synthetic weights)
# ----------------------------------------------------------------------------------
class ParamGen:
    def __init__(self, key):
        self.key = key

    def next(self):
        self.key, k = jax.random.split(self.key)
        return k

    def conv(self, cout, cin, kh, kw):
        fan_in = cin * kh * kw
        return (jax.random.normal(self.next(), (cout, cin, kh, kw), jnp.float32)
                * jnp.sqrt(2.0 / fan_in))

    def bn(self, c):
        gamma = 1.0 + 0.1 * jax.random.normal(self.next(), (c,), jnp.float32)
        beta = 0.1 * jax.random.normal(self.next(), (c,), jnp.float32)
        mean = 0.1 * jax.random.normal(self.next(), (c,), jnp.float32)
        var = 1.0 + 0.1 * jax.random.uniform(self.next(), (c,), jnp.float32)
        scale = gamma / jnp.sqrt(var + 1e-5)
        shift = beta - mean * scale
        return (scale, shift)

    def bias(self, c):
        return 0.01 * jax.random.normal(self.next(), (c,), jnp.float32)


def init_params(key, num_classes=1, num_filters=32):
    g = ParamGen(key)
    p = {}
    p['conv1_w'] = g.conv(64, 1, 7, 7)
    p['bn1'] = g.bn(64)

    def make_layer(cin, cout, nblocks, stride):
        blocks = []
        for b in range(nblocks):
            s = stride if b == 0 else 1
            blk = {
                'conv1': g.conv(cout, cin if b == 0 else cout, 3, 3),
                'bn1': g.bn(cout),
                'conv2': g.conv(cout, cout, 3, 3),
                'bn2': g.bn(cout),
                'stride': s,
            }
            if b == 0 and (s != 1 or cin != cout):
                blk['down_w'] = g.conv(cout, cin, 1, 1)
                blk['down_bn'] = g.bn(cout)
            blocks.append(blk)
        return blocks

    p['layer1'] = make_layer(64, 64, 3, 1)     # resnet34 layer1
    p['layer2'] = make_layer(64, 128, 4, 2)    # resnet34 layer2
    p['layer3'] = make_layer(128, 256, 6, 2)   # resnet34 layer3
    p['layer4'] = make_layer(256, 512, 3, 2)   # resnet34 layer4

    nf = num_filters

    def conv_relu(cin, cout):
        return {'w': g.conv(cout, cin, 3, 3), 'b': g.bias(cout)}

    def decoder(cin, cmid, cout):
        return {'conv1': conv_relu(cin, cmid), 'conv2': conv_relu(cmid, cout)}

    p['center'] = decoder(512, nf * 8 * 2, nf * 8)
    p['dec5'] = decoder(512 + nf * 8, nf * 8 * 2, nf * 8)
    p['dec4'] = decoder(256 + nf * 8, nf * 8 * 2, nf * 8)
    p['dec3'] = decoder(128 + nf * 8, nf * 4 * 2, nf * 2)
    p['dec2'] = decoder(64 + nf * 2, nf * 2 * 2, nf * 2 * 2)
    p['dec1'] = decoder(nf * 2 * 2, nf * 2 * 2, nf)
    p['dec0'] = conv_relu(nf, nf)
    p['final'] = {'w': g.conv(num_classes, nf, 1, 1), 'b': g.bias(num_classes)}
    return p


# ----------------------------------------------------------------------------------
# AlbuNet forward
# ----------------------------------------------------------------------------------
def conv_bn_act(x, w, bn, stride, pad, relu=True, residual=None):
    scale, shift = bn
    return conv2d(x, w, scale, shift, stride, pad, relu, residual)


def conv_relu_block(x, p):
    cout = p['w'].shape[0]
    return conv2d(x, p['w'], jnp.ones((cout,), jnp.float32), p['b'],
                  stride=1, padding=1, relu=True)


def basic_block(x, blk):
    identity = x
    out = conv_bn_act(x, blk['conv1'], blk['bn1'], blk['stride'], 1, relu=True)
    if 'down_w' in blk:
        identity = conv_bn_act(x, blk['down_w'], blk['down_bn'],
                               blk['stride'], 0, relu=False)
    # out = relu(bn2(conv2(out)) + identity)
    out = conv_bn_act(out, blk['conv2'], blk['bn2'], 1, 1,
                      relu=True, residual=identity)
    return out


def decoder_block(x, p):
    x = upsample2x_bilinear(x)
    x = conv_relu_block(x, p['conv1'])
    x = conv_relu_block(x, p['conv2'])
    return x


def albunet_forward(x_nchw, p):
    x = jnp.transpose(x_nchw, (0, 2, 3, 1)).astype(jnp.float32)  # NCHW -> NHWC

    # conv1: 7x7/s2 conv (no bias) + BN + ReLU + MaxPool2d(2,2)  (per the spec's self.pool)
    c1 = conv_bn_act(x, p['conv1_w'], p['bn1'], stride=2, pad=3, relu=True)
    conv1 = maxpool2x2(c1)

    conv2 = conv1
    for blk in p['layer1']:
        conv2 = basic_block(conv2, blk)
    conv3 = conv2
    for blk in p['layer2']:
        conv3 = basic_block(conv3, blk)
    conv4 = conv3
    for blk in p['layer3']:
        conv4 = basic_block(conv4, blk)
    conv5 = conv4
    for blk in p['layer4']:
        conv5 = basic_block(conv5, blk)

    center = decoder_block(maxpool2x2(conv5), p['center'])
    dec5 = decoder_block(jnp.concatenate([center, conv5], axis=-1), p['dec5'])
    dec4 = decoder_block(jnp.concatenate([dec5, conv4], axis=-1), p['dec4'])
    dec3 = decoder_block(jnp.concatenate([dec4, conv3], axis=-1), p['dec3'])
    dec2 = decoder_block(jnp.concatenate([dec3, conv2], axis=-1), p['dec2'])
    dec1 = decoder_block(dec2, p['dec1'])
    dec0 = conv_relu_block(dec1, p['dec0'])

    nc = p['final']['w'].shape[0]
    x_out = conv2d(dec0, p['final']['w'],
                   jnp.ones((nc,), jnp.float32), p['final']['b'],
                   stride=1, padding=0, relu=False)
    return jnp.transpose(x_out, (0, 3, 1, 2))  # NHWC -> NCHW


# ----------------------------------------------------------------------------------
if __name__ == "__main__":
    key = jax.random.PRNGKey(0)
    kp, kx = jax.random.split(key)
    params = init_params(kp, num_classes=1, num_filters=32)

    # conv1 expects 1 input channel; spatial must be divisible by 64 for U-Net skips.
    x = jax.random.normal(kx, (2, 1, 64, 64), jnp.float32)

    out = albunet_forward(x, params)
    out = jax.block_until_ready(out)

    assert out.shape == (2, 1, 64, 64), out.shape
    assert bool(jnp.all(jnp.isfinite(out)))
    print("KERNEL_OK")
</pallas_src>

<mosaic_0001>
module attributes {stable_mosaic.version = 11 : i64} {
  func.func @kernel(%arg0: i32, %arg1: i32, %arg2: memref<1024x128xbf16, #tpu.memory_space<vmem>>, %arg3: memref<128x128xbf16, #tpu.memory_space<vmem>>, %arg4: memref<1x128xf32, #tpu.memory_space<vmem>>, %arg5: memref<1024x128xf32, #tpu.memory_space<vmem>>, %arg6: memref<1024x128xf32, #tpu.memory_space<vmem>>) attributes {dimension_semantics = [#tpu.dimension_semantics<parallel>, #tpu.dimension_semantics<arbitrary>], iteration_bounds = array<i64: 2, 1>, scalar_prefetch = 0 : i64, scratch_operands = 1 : i64, tpu.core_type = #tpu.core_type<tc>, window_params = [{transform_indices = @transform_0, window_bounds = array<i64: 1024, 128>}, {transform_indices = @transform_1, window_bounds = array<i64: 128, 128>}, {pipeline_mode = #tpu.pipeline_mode<synchronous>, transform_indices = @transform_2, window_bounds = array<i64: 1, 128>}, {transform_indices = @transform_3, window_bounds = array<i64: 1024, 128>}]} {
    %c0_i32 = arith.constant 0 : i32
    %0 = arith.cmpi eq, %arg1, %c0_i32 : i32
    %1 = arith.extui %0 : i1 to i32
    %c0_i32_0 = arith.constant 0 : i32
    %2 = arith.cmpi ne, %1, %c0_i32_0 : i32
    scf.if %2 {
      %cst_10 = arith.constant 0.000000e+00 : f32
      %12 = vector.broadcast %cst_10 : f32 to vector<1024x128xf32>
      %c0_11 = arith.constant 0 : index
      %c0_12 = arith.constant 0 : index
      %13 = vector.load %arg6[%c0_11, %c0_12] : memref<1024x128xf32, #tpu.memory_space<vmem>>, vector<1024x128xf32>
      tpu.vector_store %arg6[%c0_11, %c0_12], %12 {strides = array<i32>} : memref<1024x128xf32, #tpu.memory_space<vmem>>, vector<1024x128xf32>,
    } else {
    }
    %c0 = arith.constant 0 : index
    %c0_1 = arith.constant 0 : index
    %3 = vector.load %arg6[%c0, %c0_1] : memref<1024x128xf32, #tpu.memory_space<vmem>>, vector<1024x128xf32>
    %c0_2 = arith.constant 0 : index
    %c0_3 = arith.constant 0 : index
    %4 = vector.load %arg2[%c0_2, %c0_3] : memref<1024x128xbf16, #tpu.memory_space<vmem>>, vector<1024x128xbf16>
    %c0_4 = arith.constant 0 : index
    %c0_5 = arith.constant 0 : index
    %5 = vector.load %arg3[%c0_4, %c0_5] : memref<128x128xbf16, #tpu.memory_space<vmem>>, vector<128x128xbf16>
    %cst = arith.constant dense<0.000000e+00> : vector<1024x128xf32>
    %6 = tpu.matmul %4, %5, %cst {dimension_numbers = #tpu.dot_dimension_numbers<[1], [0], [0], [1], [0, 0, 1, 1], [], []>} : vector<1024x128xbf16>, vector<128x128xbf16>, vector<1024x128xf32> -> vector<1024x128xf32>
    %7 = arith.addf %3, %6 : vector<1024x128xf32>
    %c0_6 = arith.constant 0 : index
    %c0_7 = arith.constant 0 : index
    %8 = vector.load %arg6[%c0_6, %c0_7] : memref<1024x128xf32, #tpu.memory_space<vmem>>, vector<1024x128xf32>
    tpu.vector_store %arg6[%c0_6, %c0_7], %7 {strides = array<i32>} : memref<1024x128xf32, #tpu.memory_space<vmem>>, vector<1024x128xf32>,
    %c0_i32_8 = arith.constant 0 : i32
    %9 = arith.cmpi eq, %arg1, %c0_i32_8 : i32
    %10 = arith.extui %9 : i1 to i32
    %c0_i32_9 = arith.constant 0 : i32
    %11 = arith.cmpi ne, %10, %c0_i32_9 : i32
    scf.if %11 {
      %c0_10 = arith.constant 0 : index
      %c0_11 = arith.constant 0 : index
      %12 = vector.load %arg6[%c0_10, %c0_11] : memref<1024x128xf32, #tpu.memory_space<vmem>>, vector<1024x128xf32>
      %c0_12 = arith.constant 0 : index
      %c0_13 = arith.constant 0 : index
      %13 = vector.load %arg4[%c0_12, %c0_13] : memref<1x128xf32, #tpu.memory_space<vmem>>, vector<1x128xf32>
      %14 = vector.broadcast %13 : vector<1x128xf32> to vector<1024x128xf32>
      %15 = arith.addf %12, %14 : vector<1024x128xf32>
      %cst_14 = arith.constant 0.000000e+00 : f32
      %16 = vector.broadcast %cst_14 : f32 to vector<1024x128xf32>
      %17 = arith.maximumf %15, %16 : vector<1024x128xf32>
      %c0_15 = arith.constant 0 : index
      %c0_16 = arith.constant 0 : index
      %18 = vector.load %arg5[%c0_15, %c0_16] : memref<1024x128xf32, #tpu.memory_space<vmem>>, vector<1024x128xf32>
      tpu.vector_store %arg5[%c0_15, %c0_16], %17 {strides = array<i32>} : memref<1024x128xf32, #tpu.memory_space<vmem>>, vector<1024x128xf32>,
    } else {
    }
    return
  }
  func.func @transform_0(%arg0: i32, %arg1: i32) -> (i32, i32) {
    %c0_i32 = arith.constant 0 : i32
    return %arg0, %arg1 : i32, i32
  }
  func.func @transform_1(%arg0: i32, %arg1: i32) -> (i32, i32) {
    %c0_i32 = arith.constant 0 : i32
    %c0_i32_0 = arith.constant 0 : i32
    return %arg1, %c0_i32 : i32, i32
  }
  func.func @transform_2(%arg0: i32, %arg1: i32) -> (i32, i32) {
    %c0_i32 = arith.constant 0 : i32
    %c0_i32_0 = arith.constant 0 : i32
    %c0_i32_1 = arith.constant 0 : i32
    return %c0_i32, %c0_i32_0 : i32, i32
  }
  func.func @transform_3(%arg0: i32, %arg1: i32) -> (i32, i32) {
    %c0_i32 = arith.constant 0 : i32
    %c0_i32_0 = arith.constant 0 : i32
    return %arg0, %c0_i32 : i32, i32
  }
}

</mosaic_0001>

<bundles_post_ra>
// kernel: tpu_custom_call.1
= control target key start
LH: loop header
LB: loop body
LE: loop exit
PB: predicated region body
PF: predicated region fallthrough
CT: control target
= control target key end

     0   :  { %8 = vsyncpa [#allocation4], 0  ;;  %s3701_s0 = inlined_call_operand.hbm [shape: bf16[2048,128], index: 0, kind: input, shape index: {}]   ;;  %s3702_s1 = inlined_call_operand.hbm [shape: bf16[128,128], index: 1, kind: input, shape index: {}]   ;;  %s3703_s2 = inlined_call_operand.vmem [shape: f32[1,128], index: 2, kind: input, shape index: {}]   ;;  %s3704_s3 = inlined_call_operand.hbm [shape: f32[2048,128], index: 3, kind: output, shape index: {}]  }
   0x1   :  { %10 = vsyncpa [#allocation4 + $0x1], 0 }
   0x2   :  { %11 = vsyncpa [#allocation7], 0 }
   0x3   :  { %12 = vsyncpa [#allocation5], 0 }
   0x4   :  { %14 = vsyncpa [#allocation5 + $0x1], 0  ;;  %s3145_s12 = smov 0   ;;  %s3147_s13 = smov 0  }
   0x5   :  { %s3149_s14 = smov 0   ;;  %s3151_s15 = smov 0  }
   0x6   :  { %s3153_s16 = smov 0   ;;  %s3155_s17 = smov 0  }
   0x7 LB: > { %s2499_s18 = sadd.s32 4294967295, %s3116_s17   ;;  %s2500_s19 = sadd.s32 4294967294, %s3116_s17   ;;  %s3116_s17 = sphi %s3155_s17, %s20_s17   ;;  %s3112_s16 = sphi %s3153_s16, %s3728_s16   ;;  %s3108_s15 = sphi %s3151_s15, %s3727_s15   ;;  %s3104_s14 = sphi %s3149_s14, %s3726_s14   ;;  %s3100_s13 = sphi %s3147_s13, %s3725_s13   ;;  %s3096_s12 = sphi %s3145_s12, %s3724_s12  }
   0x8   : > { %p54_p0 = scmp.ne.s32.totalorder %s3100_s13, %s3096_s12  ;;  %p3179_p1 = scmp.eq.s32.totalorder %s2499_s18, 0 }
   0x9   : > { %p3183_p2 = scmp.eq.s32.totalorder %s2499_s18, 1  ;;  %p131_p3 = scmp.eq.s32.totalorder %s2500_s19, 1 }
   0xa   : > { %s3709_s20 = scalar_select %p3179_p1, 1, 0 }
   0xb   : > { %s3710_s21 = scalar_select %p3183_p2, 1, 0 }
   0xc   : > { %p3189_p4 = por %p3179_p1, %p54_p0  ;;  %p2501_p5 = scmp.ge.s32.totalorder %s3116_s17, 1 }
   0xd   : > { %p3194_p6 = por %p131_p3, %p54_p0  ;;  %p138_p7 = scmp.lt.s32.totalorder %s3116_s17, 3 }
   0xe   : > { %s3711_s22 = scalar_select %p3189_p4, 1, 0 }
   0xf   : > { %s3712_s23 = scalar_select %p3194_p6, 1, 0 }
  0x10   : > { %p3199_p8 = pnand %p2501_p5, %p138_p7  ;;  %s3118_s25 = smov [#allocation6]  }
  0x11   : > { %s153_s26 = sshll.u32 %s3118_s25, 4  ;;  %s32_s28 = sadd.s32 1, %s3112_s16  ;;  %s154_s26 = int_to_ptr.vmem [resolvable:$true] %s153_s26 }
  0x12   : > { %s3713_s24 = scalar_select %p3199_p8, 1, 0 }
  0x13   : > { %p2831_p9 = pneg %p3199_p8  ;;  %s2972_s4 = scalar_lea.hbm %s3702_s1, 1024 }
  0x14   : > { %p2973_p12 = scmp.ne.s32.totalorder %s3702_s1, %s2972_s4  ;;  %p2979_p5 = scmp.lt.u32.totalorder %s2972_s4, %s3702_s1 }
  0x15   : > { %p3208_p11 = pnand %p2831_p9, %p3179_p1 }
  0x17   : > { %p2974_p13 = pneg %p3208_p11 }
  0x19   : > { %p2975_p0 = pnand %p2974_p13, %p2973_p12 }
  0x1b   : > { %p2976_p3 = pneg %p2975_p0 }
  0x1d   : > { %p2981_p7 = pnand %p2979_p5, %p2976_p3 }
  0x1f   : > { %2984 = shalt.err (!%p2981_p7)
}
  0x20   : > { %s2985_s9 = scalar_lea.vmem %s154_s26, 1024  ;;  %p2993_p1 = scmp.lt.s32.totalorder %s154_s26, %s154_s26 }
  0x21   : > { %p2986_p9 = scmp.ne.s32.totalorder %s154_s26, %s2985_s9  ;;  %p2994_p4 = scmp.lt.s32.totalorder %s2985_s9, %s2985_s9 }
  0x23   : > { %p2988_p10 = pnand %p2986_p9, %p2974_p13  ;;  %p2995_p8 = por %p2994_p4, %p2993_p1 }
  0x25   : > { %p2989_p6 = pneg %p2988_p10 }
  0x27   : > { %p2996_p2 = pnand %p2995_p8, %p2989_p6 }
  0x29   : > { %2999 = shalt.err (!%p2996_p2)
}
  0x2a   : > { %s3119_s10 = smov 64   ;;  %s3120_s11 = smov 4  }
  0x2b   : > { %2834 = dma.hbm_to_vmem [thread:$0]  (!%p3208_p11), %s3702_s1, 1024, %s154_s26, [#allocation7], %s3119_s10, %s3119_s10, %s3120_s11  }
  0x2c   : > { %p34_p1 = scmp.ge.s32.totalorder %s32_s28, 2  ;;  %s41_s25 = sadd.s32 1, %s3104_s14 }
  0x2d   : > { %p48_p2 = scmp.ne.s32.totalorder %s3104_s14, %s3100_s13  ;;  %p49_p4 = scmp.eq.s32.totalorder %s3116_s17, 0 }
  0x2e   : > { %s3730_s28 = smov (%p34_p1, %s32_s28), 0  ;;  %p3716_p8 = scmp.ne.s32.totalorder %s3710_s21, 0 }
  0x2f   : > { %p3238_p6 = por %p49_p4, %p48_p2  ;;  %s36_s30 = ssub.s32 %s3112_s16, %s3730_s28 }
  0x30   : > { %p3244_p10 = por %p3716_p8, %p48_p2  ;;  %p2844_p12 = scmp.lt.s32.totalorder %s3116_s17, 2 }
  0x31   : > { %p39_p11 = scmp.eq.s32.totalorder %s36_s30, 0  ;;  %s170_s26 = sand.u32 1, %s3104_s14  }
  0x32   : > { %s2504_s4 = sshll.u32 %s170_s26, 9  ;;  %s2589_s6 = sshll.u32 %s3112_s16, 13 }
  0x33   : > { %s3253_s5 = scalar_select %p39_p11, %s3104_s14, %s41_s25  }
  0x34   : > { %s3259_s9 = scalar_lea.hbm %s3701_s0, %s2589_s6  ;;  %s174_s21 = scalar_lea.vmem [#allocation3], %s2504_s4 }
  0x35   : > { %s182_s18 = sshll.u32 %s174_s21, 4  ;;  %p3265_p13 = pnand %p2844_p12, %p3238_p6  ;;  %s3261_s18 = int_to_ptr.vmem [resolvable:$true] %s182_s18 }
  0x36   : > { %s3269_s25 = scalar_lea.sflag [#allocation4], %s170_s26  ;;  %s3000_s30 = scalar_lea.hbm %s3259_s9, 8192 }
  0x37   : > { %p3001_p0 = scmp.ne.s32.totalorder %s3259_s9, %s3000_s30  ;;  %p3002_p3 = pneg %p3265_p13 }
  0x38   : > { %s3005_s29 = scalar_lea.hbm %s3701_s0, 16384  ;;  %p3006_p9 = scmp.lt.u32.totalorder %s3259_s9, %s3701_s0 }
  0x39   : > { %p3003_p5 = pnand %p3002_p3, %p3001_p0  ;;  %p3007_p1 = scmp.lt.u32.totalorder %s3005_s29, %s3000_s30 }
  0x3a   : > { %p3009_p4 = scmp.lt.u32.totalorder %s3000_s30, %s3259_s9 }
  0x3b   : > { %p3004_p7 = pneg %p3003_p5  ;;  %p3008_p2 = por %p3007_p1, %p3006_p9 }
  0x3d   : > { %p3010_p6 = por %p3009_p4, %p3008_p2 }
  0x3f   : > { %p3011_p8 = pnand %p3010_p6, %p3004_p7 }
  0x41   : > { %3014 = shalt.err (!%p3011_p8)
}
  0x42   : > { %s3015_s26 = scalar_lea.vmem %s3261_s18, 8192  ;;  %s3121_s21 = smov [#allocation3]  }
  0x43   : > { %p3016_p12 = scmp.ne.s32.totalorder %s3261_s18, %s3015_s26  ;;  %s3020_s4 = sshll.u32 %s3121_s21, 4  ;;  %s3021_s4 = int_to_ptr.vmem [resolvable:$false] %s3020_s4 }
  0x44   : > { %s3022_s6 = scalar_lea.vmem %s3021_s4, 16384  ;;  %p3023_p5 = scmp.lt.s32.totalorder %s3261_s18, %s3021_s4 }
  0x45   : > { %p3018_p11 = pnand %p3016_p12, %p3002_p3  ;;  %p3024_p9 = scmp.lt.s32.totalorder %s3022_s6, %s3015_s26 }
  0x47   : > { %p3019_p0 = pneg %p3018_p11  ;;  %p3025_p1 = por %p3024_p9, %p3023_p5 }
  0x49   : > { %p3026_p2 = pnand %p3025_p1, %p3019_p0 }
  0x4b   : > { %3029 = shalt.err (!%p3026_p2)
}
  0x4c   : > { %2838 = dma.hbm_to_vmem [thread:$0]  (!%p3265_p13), %s3259_s9, 8192, %s3261_s18, %s3269_s25, %s3119_s10, %s3119_s10, %s3120_s11  }
  0x4d   : > { %p3719_p3 = scmp.ne.s32.totalorder %s3713_s24, 0 }
  0x4e   : > { %s3303_s30 = sand.u32 (!%p3719_p3), 1, %s3100_s13   ;;  %p3720_p7 = scmp.ne.s32.totalorder (!%p3719_p3), %s3711_s22, 0 }
  0x4f   : > { %194 = sbr.rel (%p3719_p3) target bundleno = 477 (0x1dd), region = 32  ;;  %s2508_s29 = sshll.u32 (!%p3719_p3), %s3303_s30, 9 }
  0x50   : > { %s197_s7 = scalar_lea.sflag (!%p3719_p3), [#allocation4], %s3303_s30  ;;  %s3307_s8 = scalar_lea.vmem (!%p3719_p3), [#allocation3], %s2508_s29 }
  0x56   : > { %3083 = dma.done.wait (%p3720_p7), %s197_s7, 8192  }
  0x57   : > { %3085 = vsyncadd (%p3720_p7), %s197_s7, 4294959104  ;;  %p3721_p13 = scmp.ne.s32.totalorder %s3709_s20, 0 }
  0x59   : > { %3087 = dma.done.wait (%p3721_p13), [#allocation7], 1024  }
  0x5a   : > { %3089 = vsyncadd (%p3721_p13), [#allocation7], 4294966272  ;;  %v2900_v0 = vld [vmem:[#allocation6] sm:$0xff]   ;;  %v2901_v1 = vld [vmem:[#allocation6 + $0x8] sm:$0xff]   ;;  %s2510_s24 = sshll.u32 %s3303_s30, 10  ;;  %s2590_s11 = sshll.u32 %s3108_s15, 14 }
  0x5b   : > { %2663 = vmatprep.subr.bf16.mxu0 %v2900_v0  ;;  %2807 = vmatprep.subr.bf16.mxu1 %v2900_v0  ;;  %v2902_v2 = vld [vmem:[#allocation6 + $0x10] sm:$0xff]   ;;  %v2903_v3 = vld [vmem:[#allocation6 + $0x18] sm:$0xff]   ;;  %v2908_v4 = vld [vmem:[%s3307_s8] sm:$0xff]   ;;  %s3395_s10 = scalar_lea.vmem [#allocation8], %s2510_s24  ;;  %s3644_s19 = scalar_lea.hbm %s3704_s3, %s2590_s11 }
  0x5c   : > { %2664 = vmatpush3.bf16.msra.mxu0 %v2900_v0  ;;  %2815 = vmatpush3.bf16.msra.mxu1 %v2900_v0  ;;  %v2909_v5 = vld [vmem:[%s3307_s8 + $0x100] sm:$0xff]   ;;  %v2905_v7 = vld [vmem:[#allocation6 + $0x28] sm:$0xff]   ;;  %v2906_v8 = vld [vmem:[#allocation6 + $0x30] sm:$0xff]   ;;  %s2404_s9 = sshll.u32 %s3395_s10, 4  ;;  %s2391_s25 = scalar_lea.sflag [#allocation5], %s3303_s30  ;;  %s3646_s9 = int_to_ptr.vmem [resolvable:$true] %s2404_s9 }
  0x5d   : > { %2665 = vmatprep.subr.bf16.mxu0 %v2901_v1  ;;  %2808 = vmatprep.subr.bf16.mxu1 %v2901_v1  ;;  %v2904_v6 = vld [vmem:[#allocation6 + $0x20] sm:$0xff]   ;;  %v2907_v9 = vld [vmem:[#allocation6 + $0x38] sm:$0xff]   ;;  %v2910_v10 = vld [vmem:[%s3307_s8 + $0x8] sm:$0xff]   ;;  %s3030_s26 = scalar_lea.vmem %s3646_s9, 16384  ;;  %s3122_s21 = smov [#allocation8]  }
  0x5e   : > { %2679 = vmatprep.mubr.bf16.mxu0 %v2908_v4  ;;  %2743 = vmatprep.mubr.bf16.mxu1 %v2909_v5  ;;  %v2911_v11 = vld [vmem:[%s3307_s8 + $0x108] sm:$0xff]   ;;  %v2912_v12 = vld [vmem:[%s3307_s8 + $0x10] sm:$0xff]   ;;  %v2914_v14 = vld [vmem:[%s3307_s8 + $0x18] sm:$0xff]   ;;  %p3031_p4 = scmp.ne.s32.totalorder %s3646_s9, %s3030_s26  ;;  %s3034_s4 = sshll.u32 %s3122_s21, 4  ;;  %s3035_s4 = int_to_ptr.vmem [resolvable:$false] %s3034_s4 }
  0x5f   : > { %v2913_v13 = vld [vmem:[%s3307_s8 + $0x110] sm:$0xff]   ;;  %v2915_v15 = vld [vmem:[%s3307_s8 + $0x118] sm:$0xff]   ;;  %v2916_v16 = vld [vmem:[%s3307_s8 + $0x20] sm:$0xff]   ;;  %s3036_s6 = scalar_lea.vmem %s3035_s4, 32768  ;;  %p3037_p12 = scmp.lt.s32.totalorder %s3646_s9, %s3035_s4 }
  0x60   : > { %2666 = vmatpush3.bf16.msra.mxu0 %v2901_v1  ;;  %2816 = vmatpush3.bf16.msra.mxu1 %v2901_v1  ;;  %v2917_v17 = vld [vmem:[%s3307_s8 + $0x120] sm:$0xff]   ;;  %v2918_v18 = vld [vmem:[%s3307_s8 + $0x28] sm:$0xff]   ;;  %v2920_v20 = vld [vmem:[%s3307_s8 + $0x30] sm:$0xff]   ;;  %p3032_p6 = pnand %p3031_p4, %p3244_p10  ;;  %p3038_p11 = scmp.lt.s32.totalorder %s3036_s6, %s3030_s26 }
  0x61   : > { %2667 = vmatprep.subr.bf16.mxu0 %v2902_v2  ;;  %2809 = vmatprep.subr.bf16.mxu1 %v2902_v2  ;;  %v2919_v19 = vld [vmem:[%s3307_s8 + $0x128] sm:$0xff]   ;;  %v2921_v21 = vld [vmem:[%s3307_s8 + $0x130] sm:$0xff]   ;;  %v2922_v22 = vld [vmem:[%s3307_s8 + $0x38] sm:$0xff]  }
  0x62   : > { %v2923_v23 = vld [vmem:[%s3307_s8 + $0x138] sm:$0xff]   ;;  %v2924_v24 = vld [vmem:[%s3307_s8 + $0x40] sm:$0xff]   ;;  %v2926_v26 = vld [vmem:[%s3307_s8 + $0x48] sm:$0xff]   ;;  %p3033_p8 = pneg %p3032_p6  ;;  %p3039_p0 = por %p3038_p11, %p3037_p12 }
  0x63   : > { %v2925_v25 = vld [vmem:[%s3307_s8 + $0x140] sm:$0xff]   ;;  %v2927_v27 = vld [vmem:[%s3307_s8 + $0x148] sm:$0xff]   ;;  %v2928_v28 = vld [vmem:[%s3307_s8 + $0x50] sm:$0xff]  }
  0x64   : > { %2668 = vmatpush3.bf16.msra.mxu0 %v2902_v2  ;;  %2817 = vmatpush3.bf16.msra.mxu1 %v2902_v2  ;;  %v2929_v29 = vld [vmem:[%s3307_s8 + $0x150] sm:$0xff]   ;;  %v2930_v30 = vld [vmem:[%s3307_s8 + $0x58] sm:$0xff]   ;;  %v2932_v32 = vld [vmem:[%s3307_s8 + $0x60] sm:$0xff]   ;;  %p3040_p5 = pnand %p3039_p0, %p3033_p8 }
  0x65   : > { %2669 = vmatprep.subr.bf16.mxu0 %v2903_v3  ;;  %2810 = vmatprep.subr.bf16.mxu1 %v2903_v3  ;;  %v2931_v31 = vld [vmem:[%s3307_s8 + $0x158] sm:$0xff]   ;;  %v2933_v33 = vld [vmem:[%s3307_s8 + $0x160] sm:$0xff]   ;;  %v2934_v34 = vld [vmem:[%s3307_s8 + $0x68] sm:$0xff]  }
  0x66   : > { %v2935_v35 = vld [vmem:[%s3307_s8 + $0x168] sm:$0xff]   ;;  %v2936_v36 = vld [vmem:[%s3307_s8 + $0x70] sm:$0xff]   ;;  %v2938_v38 = vld [vmem:[%s3307_s8 + $0x78] sm:$0xff]  }
  0x67   : > { %v2937_v37 = vld [vmem:[%s3307_s8 + $0x170] sm:$0xff]   ;;  %v2939_v39 = vld [vmem:[%s3307_s8 + $0x178] sm:$0xff]   ;;  %v2940_v40 = vld [vmem:[%s3307_s8 + $0x80] sm:$0xff]  }
  0x68   : > { %2670 = vmatpush3.bf16.msra.mxu0 %v2903_v3  ;;  %2818 = vmatpush3.bf16.msra.mxu1 %v2903_v3  ;;  %v2941_v41 = vld [vmem:[%s3307_s8 + $0x180] sm:$0xff]   ;;  %v2942_v42 = vld [vmem:[%s3307_s8 + $0x88] sm:$0xff]   ;;  %v2944_v44 = vld [vmem:[%s3307_s8 + $0x90] sm:$0xff]  }
  0x69   : > { %2671 = vmatprep.subr.bf16.mxu0 %v2904_v6  ;;  %2811 = vmatprep.subr.bf16.mxu1 %v2904_v6  ;;  %v2943_v43 = vld [vmem:[%s3307_s8 + $0x188] sm:$0xff]   ;;  %v2945_v45 = vld [vmem:[%s3307_s8 + $0x190] sm:$0xff]   ;;  %v2946_v46 = vld [vmem:[%s3307_s8 + $0x98] sm:$0xff]  }
  0x6a   : > { %v2947_v47 = vld [vmem:[%s3307_s8 + $0x198] sm:$0xff]   ;;  %v2948_v48 = vld [vmem:[%s3307_s8 + $0xa0] sm:$0xff]   ;;  %v2950_v50 = vld [vmem:[%s3307_s8 + $0xa8] sm:$0xff]  }
  0x6b   : > { %v2949_v49 = vld [vmem:[%s3307_s8 + $0x1a0] sm:$0xff]   ;;  %v2951_v51 = vld [vmem:[%s3307_s8 + $0x1a8] sm:$0xff]   ;;  %v2952_v52 = vld [vmem:[%s3307_s8 + $0xb0] sm:$0xff]  }
  0x6c   : > { %2672 = vmatpush3.bf16.msra.mxu0 %v2904_v6  ;;  %2819 = vmatpush3.bf16.msra.mxu1 %v2904_v6  ;;  %v2953_v53 = vld [vmem:[%s3307_s8 + $0x1b0] sm:$0xff]   ;;  %v2954_v54 = vld [vmem:[%s3307_s8 + $0xb8] sm:$0xff]   ;;  %v2956_v56 = vld [vmem:[%s3307_s8 + $0xc0] sm:$0xff]  }
  0x6d   : > { %2673 = vmatprep.subr.bf16.mxu0 %v2905_v7  ;;  %2812 = vmatprep.subr.bf16.mxu1 %v2905_v7  ;;  %v2955_v55 = vld [vmem:[%s3307_s8 + $0x1b8] sm:$0xff]   ;;  %v2957_v57 = vld [vmem:[%s3307_s8 + $0x1c0] sm:$0xff]   ;;  %v2958_v58 = vld [vmem:[%s3307_s8 + $0xc8] sm:$0xff]  }
  0x6e   : > { %v2959_v59 = vld [vmem:[%s3307_s8 + $0x1c8] sm:$0xff]   ;;  %v2960_v60 = vld [vmem:[%s3307_s8 + $0xd0] sm:$0xff]   ;;  %v2962_v62 = vld [vmem:[%s3307_s8 + $0xd8] sm:$0xff]  }
  0x6f   : > { %v2961_v61 = vld [vmem:[%s3307_s8 + $0x1d0] sm:$0xff]   ;;  %v2963_v63 = vld [vmem:[%s3307_s8 + $0x1d8] sm:$0xff]   ;;  %v2964_v0 = vld [vmem:[%s3307_s8 + $0xe0] sm:$0xff]  }
  0x70   : > { %2674 = vmatpush3.bf16.msra.mxu0 %v2905_v7  ;;  %2820 = vmatpush3.bf16.msra.mxu1 %v2905_v7  ;;  %v2965_v1 = vld [vmem:[%s3307_s8 + $0x1e0] sm:$0xff]   ;;  %v2966_v2 = vld [vmem:[%s3307_s8 + $0xe8] sm:$0xff]   ;;  %v2968_v4 = vld [vmem:[%s3307_s8 + $0xf0] sm:$0xff]  }
  0x71   : > { %2675 = vmatprep.subr.bf16.mxu0 %v2906_v8  ;;  %2813 = vmatprep.subr.bf16.mxu1 %v2906_v8  ;;  %v2967_v3 = vld [vmem:[%s3307_s8 + $0x1e8] sm:$0xff]   ;;  %v2969_v5 = vld [vmem:[%s3307_s8 + $0x1f0] sm:$0xff]   ;;  %v2970_v6 = vld [vmem:[%s3307_s8 + $0xf8] sm:$0xff]  }
  0x72   : > { %v2971_v7 = vld [vmem:[%s3307_s8 + $0x1f8] sm:$0xff]  }
  0x74   : > { %2676 = vmatpush3.bf16.msra.mxu0 %v2906_v8  ;;  %2821 = vmatpush3.bf16.msra.mxu1 %v2906_v8  ;;  %v3384_v8 = vld [vmem:[%s3703_s2] ss:$0 sm:$0xff] }
  0x75   : > { %2677 = vmatprep.subr.bf16.mxu0 %v2907_v9  ;;  %2814 = vmatprep.subr.bf16.mxu1 %v2907_v9 }
  0x78   : > { %2678 = vmatpush3.bf16.msra.mxu0 %v2907_v9  ;;  %2822 = vmatpush3.bf16.msra.mxu1 %v2907_v9 }
  0x7b   : > { %2680 = vmatmul.mubr.bf16.vlgmr.msra.gmra.mrb[0].mxu0 %v2910_v10  ;;  %2744 = vmatmul.mubr.bf16.vlgmr.msra.gmra.mrb[0].mxu1 %v2911_v11 }
  0x7c   : > { %2683 = vmatprep.mubr.bf16.mxu0 %v2912_v12  ;;  %2747 = vmatprep.mubr.bf16.mxu1 %v2913_v13 }
  0x83   : > { %2684 = vmatmul.mubr.bf16.gmra.mrb[4].mxu0 %v2914_v14  ;;  %2748 = vmatmul.mubr.bf16.gmra.mrb[4].mxu1 %v2915_v15 }
  0x84   : > { %2687 = vmatprep.mubr.bf16.mxu0 %v2916_v16  ;;  %2751 = vmatprep.mubr.bf16.mxu1 %v2917_v17 }
  0x8b   : > { %2688 = vmatmul.mubr.bf16.gmra.mrb[8].mxu0 %v2918_v18  ;;  %2752 = vmatmul.mubr.bf16.gmra.mrb[8].mxu1 %v2919_v19 }
  0x8c   : > { %2691 = vmatprep.mubr.bf16.mxu0 %v2920_v20  ;;  %2755 = vmatprep.mubr.bf16.mxu1 %v2921_v21 }
  0x93   : > { %2692 = vmatmul.mubr.bf16.gmra.mrb[12].mxu0 %v2922_v22  ;;  %2756 = vmatmul.mubr.bf16.gmra.mrb[12].mxu1 %v2923_v23 }
  0x94   : > { %2695 = vmatprep.mubr.bf16.mxu0 %v2924_v24  ;;  %2759 = vmatprep.mubr.bf16.mxu1 %v2925_v25 }
  0x9b   : > { %2696 = vmatmul.mubr.bf16.gmra.mrb[16].mxu0 %v2926_v26  ;;  %2760 = vmatmul.mubr.bf16.gmra.mrb[16].mxu1 %v2927_v27 }
  0x9c   : > { %2699 = vmatprep.mubr.bf16.mxu0 %v2928_v28  ;;  %2763 = vmatprep.mubr.bf16.mxu1 %v2929_v29 }
  0xa3   : > { %2700 = vmatmul.mubr.bf16.gmra.mrb[20].mxu0 %v2930_v30  ;;  %2764 = vmatmul.mubr.bf16.gmra.mrb[20].mxu1 %v2931_v31 }
  0xa4   : > { %2703 = vmatprep.mubr.bf16.mxu0 %v2932_v32  ;;  %2767 = vmatprep.mubr.bf16.mxu1 %v2933_v33 }
  0xab   : > { %2704 = vmatmul.mubr.bf16.gmra.mrb[24].mxu0 %v2934_v34  ;;  %2768 = vmatmul.mubr.bf16.gmra.mrb[24].mxu1 %v2935_v35 }
  0xac   : > { %2707 = vmatprep.mubr.bf16.mxu0 %v2936_v36  ;;  %2771 = vmatprep.mubr.bf16.mxu1 %v2937_v37 }
  0xb3   : > { %2708 = vmatmul.mubr.bf16.gmra.mrb[28].mxu0 %v2938_v38  ;;  %2772 = vmatmul.mubr.bf16.gmra.mrb[28].mxu1 %v2939_v39 }
  0xb4   : > { %2711 = vmatprep.mubr.bf16.mxu0 %v2940_v40  ;;  %2775 = vmatprep.mubr.bf16.mxu1 %v2941_v41 }
  0xbb   : > { %2712 = vmatmul.mubr.bf16.gmra.mrb[32].mxu0 %v2942_v42  ;;  %2776 = vmatmul.mubr.bf16.gmra.mrb[32].mxu1 %v2943_v43 }
  0xbc   : > { %2715 = vmatprep.mubr.bf16.mxu0 %v2944_v44  ;;  %2779 = vmatprep.mubr.bf16.mxu1 %v2945_v45 }
  0xc3   : > { %2716 = vmatmul.mubr.bf16.gmra.mrb[36].mxu0 %v2946_v46  ;;  %2780 = vmatmul.mubr.bf16.gmra.mrb[36].mxu1 %v2947_v47 }
  0xc4   : > { %2719 = vmatprep.mubr.bf16.mxu0 %v2948_v48  ;;  %2783 = vmatprep.mubr.bf16.mxu1 %v2949_v49 }
  0xcb   : > { %2720 = vmatmul.mubr.bf16.gmra.mrb[40].mxu0 %v2950_v50  ;;  %2784 = vmatmul.mubr.bf16.gmra.mrb[40].mxu1 %v2951_v51 }
  0xcc   : > { %2723 = vmatprep.mubr.bf16.mxu0 %v2952_v52  ;;  %2787 = vmatprep.mubr.bf16.mxu1 %v2953_v53 }
  0xd3   : > { %2724 = vmatmul.mubr.bf16.gmra.mrb[44].mxu0 %v2954_v54  ;;  %2788 = vmatmul.mubr.bf16.gmra.mrb[44].mxu1 %v2955_v55 }
  0xd4   : > { %2727 = vmatprep.mubr.bf16.mxu0 %v2956_v56  ;;  %2791 = vmatprep.mubr.bf16.mxu1 %v2957_v57 }
  0xdb   : > { %2728 = vmatmul.mubr.bf16.gmra.mrb[48].mxu0 %v2958_v58  ;;  %2792 = vmatmul.mubr.bf16.gmra.mrb[48].mxu1 %v2959_v59 }
  0xdc   : > { %2731 = vmatprep.mubr.bf16.mxu0 %v2960_v60  ;;  %2795 = vmatprep.mubr.bf16.mxu1 %v2961_v61 }
  0xe3   : > { %2732 = vmatmul.mubr.bf16.gmra.mrb[52].mxu0 %v2962_v62  ;;  %2796 = vmatmul.mubr.bf16.gmra.mrb[52].mxu1 %v2963_v63 }
  0xe4   : > { %2735 = vmatprep.mubr.bf16.mxu0 %v2964_v0  ;;  %2799 = vmatprep.mubr.bf16.mxu1 %v2965_v1 }
  0xeb   : > { %2736 = vmatmul.mubr.bf16.gmra.mrb[56].mxu0 %v2966_v2  ;;  %2800 = vmatmul.mubr.bf16.gmra.mrb[56].mxu1 %v2967_v3 }
  0xec   : > { %2739 = vmatprep.mubr.bf16.mxu0 %v2968_v4  ;;  %2803 = vmatprep.mubr.bf16.mxu1 %v2969_v5 }
  0xf3   : > { %2740 = vmatmul.mubr.bf16.gmra.mrb[60].mxu0 %v2970_v6  ;;  %2804 = vmatmul.mubr.bf16.gmra.mrb[60].mxu1 %v2971_v7 }
 0x14e   : > { %v2681_v9 = vpop.f32.mrb[0].mxu0  ;;  %v2745_v10 = vpop.f32.mrb[0].mxu1 }
 0x14f   : > { %v2008_v11 = vadd.f32 %v2681_v9, %v3384_v8  ;;  %v2072_v12 = vadd.f32 %v2745_v10, %v3384_v8  ;;  %v1101_v13 = vpop.f32.mrb[1].mxu0  ;;  %v1357_v14 = vpop.f32.mrb[1].mxu1 }
 0x150   : > { %v2006_v15 = vadd.f32 %v3384_v8, %v1101_v13  ;;  %v2070_v16 = vadd.f32 %v3384_v8, %v1357_v14  ;;  %v2682_v17 = vpop.f32.mrb[2].mxu0  ;;  %v2746_v18 = vpop.f32.mrb[2].mxu1 }
 0x151   : > { %v2136_v19 = vmax.f32 %v2008_v11, 0.0  ;;  %v2200_v20 = vmax.f32 %v2072_v12, 0.0  ;;  %v2009_v21 = vadd.f32 %v2682_v17, %v3384_v8  ;;  %v2073_v22 = vadd.f32 %v2746_v18, %v3384_v8  ;;  %v1104_v23 = vpop.f32.mrb[3].mxu0  ;;  %v1360_v24 = vpop.f32.mrb[3].mxu1 }
 0x152   : > { %v2134_v25 = vmax.f32 %v2006_v15, 0.0  ;;  %v2198_v26 = vmax.f32 %v2070_v16, 0.0  ;;  %v2007_v27 = vadd.f32 %v3384_v8, %v1104_v23  ;;  %v2071_v28 = vadd.f32 %v3384_v8, %v1360_v24 }
 0x153   : > { %2264 = vst [vmem:[%s3395_s10 + $0x10] sm:$0xff] %v2136_v19  ;;  %2328 = vst [vmem:[%s3395_s10 + $0x210] sm:$0xff] %v2200_v20  ;;  %v2137_v29 = vmax.f32 %v2009_v21, 0.0  ;;  %v2201_v30 = vmax.f32 %v2073_v22, 0.0 }
 0x154   : > { %2262 = vst [vmem:[%s3395_s10] sm:$0xff] %v2134_v25  ;;  %2326 = vst [vmem:[%s3395_s10 + $0x200] sm:$0xff] %v2198_v26  ;;  %v2135_v31 = vmax.f32 %v2007_v27, 0.0  ;;  %v2199_v32 = vmax.f32 %v2071_v28, 0.0 }
 0x155   : > { %2265 = vst [vmem:[%s3395_s10 + $0x18] sm:$0xff] %v2137_v29  ;;  %2329 = vst [vmem:[%s3395_s10 + $0x218] sm:$0xff] %v2201_v30 }
 0x156   : > { %2263 = vst [vmem:[%s3395_s10 + $0x8] sm:$0xff] %v2135_v31  ;;  %2327 = vst [vmem:[%s3395_s10 + $0x208] sm:$0xff] %v2199_v32  ;;  %v2685_v33 = vpop.f32.mrb[4].mxu0  ;;  %v2749_v34 = vpop.f32.mrb[4].mxu1 }
 0x157   : > { %v2012_v35 = vadd.f32 %v2685_v33, %v3384_v8  ;;  %v2076_v36 = vadd.f32 %v2749_v34, %v3384_v8  ;;  %v1117_v37 = vpop.f32.mrb[5].mxu0  ;;  %v1373_v38 = vpop.f32.mrb[5].mxu1 }
 0x158   : > { %v2010_v39 = vadd.f32 %v3384_v8, %v1117_v37  ;;  %v2074_v40 = vadd.f32 %v3384_v8, %v1373_v38  ;;  %v2686_v41 = vpop.f32.mrb[6].mxu0  ;;  %v2750_v42 = vpop.f32.mrb[6].mxu1 }
 0x159   : > { %v2140_v43 = vmax.f32 %v2012_v35, 0.0  ;;  %v2204_v44 = vmax.f32 %v2076_v36, 0.0  ;;  %v2013_v45 = vadd.f32 %v2686_v41, %v3384_v8  ;;  %v2077_v46 = vadd.f32 %v2750_v42, %v3384_v8  ;;  %v1120_v47 = vpop.f32.mrb[7].mxu0  ;;  %v1376_v48 = vpop.f32.mrb[7].mxu1 }
 0x15a   : > { %v2138_v49 = vmax.f32 %v2010_v39, 0.0  ;;  %v2202_v50 = vmax.f32 %v2074_v40, 0.0  ;;  %v2011_v51 = vadd.f32 %v3384_v8, %v1120_v47  ;;  %v2075_v52 = vadd.f32 %v3384_v8, %v1376_v48 }
 0x15b   : > { %2268 = vst [vmem:[%s3395_s10 + $0x30] sm:$0xff] %v2140_v43  ;;  %2332 = vst [vmem:[%s3395_s10 + $0x230] sm:$0xff] %v2204_v44  ;;  %v2141_v53 = vmax.f32 %v2013_v45, 0.0  ;;  %v2205_v54 = vmax.f32 %v2077_v46, 0.0 }
 0x15c   : > { %2266 = vst [vmem:[%s3395_s10 + $0x20] sm:$0xff] %v2138_v49  ;;  %2330 = vst [vmem:[%s3395_s10 + $0x220] sm:$0xff] %v2202_v50  ;;  %v2139_v55 = vmax.f32 %v2011_v51, 0.0  ;;  %v2203_v56 = vmax.f32 %v2075_v52, 0.0 }
 0x15d   : > { %2269 = vst [vmem:[%s3395_s10 + $0x38] sm:$0xff] %v2141_v53  ;;  %2333 = vst [vmem:[%s3395_s10 + $0x238] sm:$0xff] %v2205_v54 }
 0x15e   : > { %2267 = vst [vmem:[%s3395_s10 + $0x28] sm:$0xff] %v2139_v55  ;;  %2331 = vst [vmem:[%s3395_s10 + $0x228] sm:$0xff] %v2203_v56  ;;  %v2689_v57 = vpop.f32.mrb[8].mxu0  ;;  %v2753_v58 = vpop.f32.mrb[8].mxu1 }
 0x15f   : > { %v2016_v59 = vadd.f32 %v2689_v57, %v3384_v8  ;;  %v2080_v60 = vadd.f32 %v2753_v58, %v3384_v8  ;;  %v1133_v61 = vpop.f32.mrb[9].mxu0  ;;  %v1389_v62 = vpop.f32.mrb[9].mxu1 }
 0x160   : > { %v2014_v63 = vadd.f32 %v3384_v8, %v1133_v61  ;;  %v2078_v0 = vadd.f32 %v3384_v8, %v1389_v62  ;;  %v2690_v1 = vpop.f32.mrb[10].mxu0  ;;  %v2754_v2 = vpop.f32.mrb[10].mxu1 }
 0x161   : > { %v2144_v3 = vmax.f32 %v2016_v59, 0.0  ;;  %v2208_v4 = vmax.f32 %v2080_v60, 0.0  ;;  %v2017_v5 = vadd.f32 %v2690_v1, %v3384_v8  ;;  %v2081_v6 = vadd.f32 %v2754_v2, %v3384_v8  ;;  %v1136_v7 = vpop.f32.mrb[11].mxu0  ;;  %v1392_v9 = vpop.f32.mrb[11].mxu1 }
 0x162   : > { %v2142_v10 = vmax.f32 %v2014_v63, 0.0  ;;  %v2206_v11 = vmax.f32 %v2078_v0, 0.0  ;;  %v2015_v12 = vadd.f32 %v3384_v8, %v1136_v7  ;;  %v2079_v13 = vadd.f32 %v3384_v8, %v1392_v9 }
 0x163   : > { %2272 = vst [vmem:[%s3395_s10 + $0x50] sm:$0xff] %v2144_v3  ;;  %2336 = vst [vmem:[%s3395_s10 + $0x250] sm:$0xff] %v2208_v4  ;;  %v2145_v14 = vmax.f32 %v2017_v5, 0.0  ;;  %v2209_v15 = vmax.f32 %v2081_v6, 0.0 }
 0x164   : > { %2270 = vst [vmem:[%s3395_s10 + $0x40] sm:$0xff] %v2142_v10  ;;  %2334 = vst [vmem:[%s3395_s10 + $0x240] sm:$0xff] %v2206_v11  ;;  %v2143_v16 = vmax.f32 %v2015_v12, 0.0  ;;  %v2207_v17 = vmax.f32 %v2079_v13, 0.0 }
 0x165   : > { %2273 = vst [vmem:[%s3395_s10 + $0x58] sm:$0xff] %v2145_v14  ;;  %2337 = vst [vmem:[%s3395_s10 + $0x258] sm:$0xff] %v2209_v15 }
 0x166   : > { %2271 = vst [vmem:[%s3395_s10 + $0x48] sm:$0xff] %v2143_v16  ;;  %2335 = vst [vmem:[%s3395_s10 + $0x248] sm:$0xff] %v2207_v17  ;;  %v2693_v18 = vpop.f32.mrb[12].mxu0  ;;  %v2757_v19 = vpop.f32.mrb[12].mxu1 }
 0x167   : > { %v2020_v20 = vadd.f32 %v2693_v18, %v3384_v8  ;;  %v2084_v21 = vadd.f32 %v2757_v19, %v3384_v8  ;;  %v1149_v22 = vpop.f32.mrb[13].mxu0  ;;  %v1405_v23 = vpop.f32.mrb[13].mxu1 }
 0x168   : > { %v2018_v24 = vadd.f32 %v3384_v8, %v1149_v22  ;;  %v2082_v25 = vadd.f32 %v3384_v8, %v1405_v23  ;;  %v2694_v26 = vpop.f32.mrb[14].mxu0  ;;  %v2758_v27 = vpop.f32.mrb[14].mxu1 }
 0x169   : > { %v2148_v28 = vmax.f32 %v2020_v20, 0.0  ;;  %v2212_v29 = vmax.f32 %v2084_v21, 0.0  ;;  %v2021_v30 = vadd.f32 %v2694_v26, %v3384_v8  ;;  %v2085_v31 = vadd.f32 %v2758_v27, %v3384_v8  ;;  %v1152_v32 = vpop.f32.mrb[15].mxu0  ;;  %v1408_v33 = vpop.f32.mrb[15].mxu1 }
 0x16a   : > { %v2146_v34 = vmax.f32 %v2018_v24, 0.0  ;;  %v2210_v35 = vmax.f32 %v2082_v25, 0.0  ;;  %v2019_v36 = vadd.f32 %v3384_v8, %v1152_v32  ;;  %v2083_v37 = vadd.f32 %v3384_v8, %v1408_v33 }
 0x16b   : > { %2276 = vst [vmem:[%s3395_s10 + $0x70] sm:$0xff] %v2148_v28  ;;  %2340 = vst [vmem:[%s3395_s10 + $0x270] sm:$0xff] %v2212_v29  ;;  %v2149_v38 = vmax.f32 %v2021_v30, 0.0  ;;  %v2213_v39 = vmax.f32 %v2085_v31, 0.0 }
 0x16c   : > { %2274 = vst [vmem:[%s3395_s10 + $0x60] sm:$0xff] %v2146_v34  ;;  %2338 = vst [vmem:[%s3395_s10 + $0x260] sm:$0xff] %v2210_v35  ;;  %v2147_v40 = vmax.f32 %v2019_v36, 0.0  ;;  %v2211_v41 = vmax.f32 %v2083_v37, 0.0 }
 0x16d   : > { %2277 = vst [vmem:[%s3395_s10 + $0x78] sm:$0xff] %v2149_v38  ;;  %2341 = vst [vmem:[%s3395_s10 + $0x278] sm:$0xff] %v2213_v39 }
 0x16e   : > { %2275 = vst [vmem:[%s3395_s10 + $0x68] sm:$0xff] %v2147_v40  ;;  %2339 = vst [vmem:[%s3395_s10 + $0x268] sm:$0xff] %v2211_v41  ;;  %v2697_v42 = vpop.f32.mrb[16].mxu0  ;;  %v2761_v43 = vpop.f32.mrb[16].mxu1 }
 0x16f   : > { %v2024_v44 = vadd.f32 %v2697_v42, %v3384_v8  ;;  %v2088_v45 = vadd.f32 %v2761_v43, %v3384_v8  ;;  %v1165_v46 = vpop.f32.mrb[17].mxu0  ;;  %v1421_v47 = vpop.f32.mrb[17].mxu1 }
 0x170   : > { %v2022_v48 = vadd.f32 %v3384_v8, %v1165_v46  ;;  %v2086_v49 = vadd.f32 %v3384_v8, %v1421_v47  ;;  %v2698_v50 = vpop.f32.mrb[18].mxu0  ;;  %v2762_v51 = vpop.f32.mrb[18].mxu1 }
 0x171   : > { %v2152_v52 = vmax.f32 %v2024_v44, 0.0  ;;  %v2216_v53 = vmax.f32 %v2088_v45, 0.0  ;;  %v2025_v54 = vadd.f32 %v2698_v50, %v3384_v8  ;;  %v2089_v55 = vadd.f32 %v2762_v51, %v3384_v8  ;;  %v1168_v56 = vpop.f32.mrb[19].mxu0  ;;  %v1424_v57 = vpop.f32.mrb[19].mxu1 }
 0x172   : > { %v2150_v58 = vmax.f32 %v2022_v48, 0.0  ;;  %v2214_v59 = vmax.f32 %v2086_v49, 0.0  ;;  %v2023_v60 = vadd.f32 %v3384_v8, %v1168_v56  ;;  %v2087_v61 = vadd.f32 %v3384_v8, %v1424_v57 }
 0x173   : > { %2280 = vst [vmem:[%s3395_s10 + $0x90] sm:$0xff] %v2152_v52  ;;  %2344 = vst [vmem:[%s3395_s10 + $0x290] sm:$0xff] %v2216_v53  ;;  %v2153_v62 = vmax.f32 %v2025_v54, 0.0  ;;  %v2217_v63 = vmax.f32 %v2089_v55, 0.0 }
 0x174   : > { %2278 = vst [vmem:[%s3395_s10 + $0x80] sm:$0xff] %v2150_v58  ;;  %2342 = vst [vmem:[%s3395_s10 + $0x280] sm:$0xff] %v2214_v59  ;;  %v2151_v0 = vmax.f32 %v2023_v60, 0.0  ;;  %v2215_v1 = vmax.f32 %v2087_v61, 0.0 }
 0x175   : > { %2281 = vst [vmem:[%s3395_s10 + $0x98] sm:$0xff] %v2153_v62  ;;  %2345 = vst [vmem:[%s3395_s10 + $0x298] sm:$0xff] %v2217_v63 }
 0x176   : > { %2279 = vst [vmem:[%s3395_s10 + $0x88] sm:$0xff] %v2151_v0  ;;  %2343 = vst [vmem:[%s3395_s10 + $0x288] sm:$0xff] %v2215_v1  ;;  %v2701_v2 = vpop.f32.mrb[20].mxu0  ;;  %v2765_v3 = vpop.f32.mrb[20].mxu1 }
 0x177   : > { %v2028_v4 = vadd.f32 %v2701_v2, %v3384_v8  ;;  %v2092_v5 = vadd.f32 %v2765_v3, %v3384_v8  ;;  %v1181_v6 = vpop.f32.mrb[21].mxu0  ;;  %v1437_v7 = vpop.f32.mrb[21].mxu1 }
 0x178   : > { %v2026_v9 = vadd.f32 %v3384_v8, %v1181_v6  ;;  %v2090_v10 = vadd.f32 %v3384_v8, %v1437_v7  ;;  %v2702_v11 = vpop.f32.mrb[22].mxu0  ;;  %v2766_v12 = vpop.f32.mrb[22].mxu1 }
 0x179   : > { %v2156_v13 = vmax.f32 %v2028_v4, 0.0  ;;  %v2220_v14 = vmax.f32 %v2092_v5, 0.0  ;;  %v2029_v15 = vadd.f32 %v2702_v11, %v3384_v8  ;;  %v2093_v16 = vadd.f32 %v2766_v12, %v3384_v8  ;;  %v1184_v17 = vpop.f32.mrb[23].mxu0  ;;  %v1440_v18 = vpop.f32.mrb[23].mxu1 }
 0x17a   : > { %v2154_v19 = vmax.f32 %v2026_v9, 0.0  ;;  %v2218_v20 = vmax.f32 %v2090_v10, 0.0  ;;  %v2027_v21 = vadd.f32 %v3384_v8, %v1184_v17  ;;  %v2091_v22 = vadd.f32 %v3384_v8, %v1440_v18 }
 0x17b   : > { %2284 = vst [vmem:[%s3395_s10 + $0xb0] sm:$0xff] %v2156_v13  ;;  %2348 = vst [vmem:[%s3395_s10 + $0x2b0] sm:$0xff] %v2220_v14  ;;  %v2157_v23 = vmax.f32 %v2029_v15, 0.0  ;;  %v2221_v24 = vmax.f32 %v2093_v16, 0.0 }
 0x17c   : > { %2282 = vst [vmem:[%s3395_s10 + $0xa0] sm:$0xff] %v2154_v19  ;;  %2346 = vst [vmem:[%s3395_s10 + $0x2a0] sm:$0xff] %v2218_v20  ;;  %v2155_v25 = vmax.f32 %v2027_v21, 0.0  ;;  %v2219_v26 = vmax.f32 %v2091_v22, 0.0 }
 0x17d   : > { %2285 = vst [vmem:[%s3395_s10 + $0xb8] sm:$0xff] %v2157_v23  ;;  %2349 = vst [vmem:[%s3395_s10 + $0x2b8] sm:$0xff] %v2221_v24 }
 0x17e   : > { %2283 = vst [vmem:[%s3395_s10 + $0xa8] sm:$0xff] %v2155_v25  ;;  %2347 = vst [vmem:[%s3395_s10 + $0x2a8] sm:$0xff] %v2219_v26  ;;  %v2705_v27 = vpop.f32.mrb[24].mxu0  ;;  %v2769_v28 = vpop.f32.mrb[24].mxu1 }
 0x17f   : > { %v2032_v29 = vadd.f32 %v2705_v27, %v3384_v8  ;;  %v2096_v30 = vadd.f32 %v2769_v28, %v3384_v8  ;;  %v1197_v31 = vpop.f32.mrb[25].mxu0  ;;  %v1453_v32 = vpop.f32.mrb[25].mxu1 }
 0x180   : > { %v2030_v33 = vadd.f32 %v3384_v8, %v1197_v31  ;;  %v2094_v34 = vadd.f32 %v3384_v8, %v1453_v32  ;;  %v2706_v35 = vpop.f32.mrb[26].mxu0  ;;  %v2770_v36 = vpop.f32.mrb[26].mxu1 }
 0x181   : > { %v2160_v37 = vmax.f32 %v2032_v29, 0.0  ;;  %v2224_v38 = vmax.f32 %v2096_v30, 0.0  ;;  %v2033_v39 = vadd.f32 %v2706_v35, %v3384_v8  ;;  %v2097_v40 = vadd.f32 %v2770_v36, %v3384_v8  ;;  %v1200_v41 = vpop.f32.mrb[27].mxu0  ;;  %v1456_v42 = vpop.f32.mrb[27].mxu1 }
 0x182   : > { %v2158_v43 = vmax.f32 %v2030_v33, 0.0  ;;  %v2222_v44 = vmax.f32 %v2094_v34, 0.0  ;;  %v2031_v45 = vadd.f32 %v3384_v8, %v1200_v41  ;;  %v2095_v46 = vadd.f32 %v3384_v8, %v1456_v42 }
 0x183   : > { %2288 = vst [vmem:[%s3395_s10 + $0xd0] sm:$0xff] %v2160_v37  ;;  %2352 = vst [vmem:[%s3395_s10 + $0x2d0] sm:$0xff] %v2224_v38  ;;  %v2161_v47 = vmax.f32 %v2033_v39, 0.0  ;;  %v2225_v48 = vmax.f32 %v2097_v40, 0.0 }
 0x184   : > { %2286 = vst [vmem:[%s3395_s10 + $0xc0] sm:$0xff] %v2158_v43  ;;  %2350 = vst [vmem:[%s3395_s10 + $0x2c0] sm:$0xff] %v2222_v44  ;;  %v2159_v49 = vmax.f32 %v2031_v45, 0.0  ;;  %v2223_v50 = vmax.f32 %v2095_v46, 0.0 }
 0x185   : > { %2289 = vst [vmem:[%s3395_s10 + $0xd8] sm:$0xff] %v2161_v47  ;;  %2353 = vst [vmem:[%s3395_s10 + $0x2d8] sm:$0xff] %v2225_v48 }
 0x186   : > { %2287 = vst [vmem:[%s3395_s10 + $0xc8] sm:$0xff] %v2159_v49  ;;  %2351 = vst [vmem:[%s3395_s10 + $0x2c8] sm:$0xff] %v2223_v50  ;;  %v2709_v51 = vpop.f32.mrb[28].mxu0  ;;  %v2773_v52 = vpop.f32.mrb[28].mxu1 }
 0x187   : > { %v2036_v53 = vadd.f32 %v2709_v51, %v3384_v8  ;;  %v2100_v54 = vadd.f32 %v2773_v52, %v3384_v8  ;;  %v1213_v55 = vpop.f32.mrb[29].mxu0  ;;  %v1469_v56 = vpop.f32.mrb[29].mxu1 }
 0x188   : > { %v2034_v57 = vadd.f32 %v3384_v8, %v1213_v55  ;;  %v2098_v58 = vadd.f32 %v3384_v8, %v1469_v56  ;;  %v2710_v59 = vpop.f32.mrb[30].mxu0  ;;  %v2774_v60 = vpop.f32.mrb[30].mxu1 }
 0x189   : > { %v2164_v61 = vmax.f32 %v2036_v53, 0.0  ;;  %v2228_v62 = vmax.f32 %v2100_v54, 0.0  ;;  %v2037_v63 = vadd.f32 %v2710_v59, %v3384_v8  ;;  %v2101_v0 = vadd.f32 %v2774_v60, %v3384_v8  ;;  %v1216_v1 = vpop.f32.mrb[31].mxu0  ;;  %v1472_v2 = vpop.f32.mrb[31].mxu1 }
 0x18a   : > { %v2162_v3 = vmax.f32 %v2034_v57, 0.0  ;;  %v2226_v4 = vmax.f32 %v2098_v58, 0.0  ;;  %v2035_v5 = vadd.f32 %v3384_v8, %v1216_v1  ;;  %v2099_v6 = vadd.f32 %v3384_v8, %v1472_v2 }
 0x18b   : > { %2292 = vst [vmem:[%s3395_s10 + $0xf0] sm:$0xff] %v2164_v61  ;;  %2356 = vst [vmem:[%s3395_s10 + $0x2f0] sm:$0xff] %v2228_v62  ;;  %v2165_v7 = vmax.f32 %v2037_v63, 0.0  ;;  %v2229_v9 = vmax.f32 %v2101_v0, 0.0 }
 0x18c   : > { %2290 = vst [vmem:[%s3395_s10 + $0xe0] sm:$0xff] %v2162_v3  ;;  %2354 = vst [vmem:[%s3395_s10 + $0x2e0] sm:$0xff] %v2226_v4  ;;  %v2163_v10 = vmax.f32 %v2035_v5, 0.0  ;;  %v2227_v11 = vmax.f32 %v2099_v6, 0.0 }
 0x18d   : > { %2293 = vst [vmem:[%s3395_s10 + $0xf8] sm:$0xff] %v2165_v7  ;;  %2357 = vst [vmem:[%s3395_s10 + $0x2f8] sm:$0xff] %v2229_v9 }
 0x18e   : > { %2291 = vst [vmem:[%s3395_s10 + $0xe8] sm:$0xff] %v2163_v10  ;;  %2355 = vst [vmem:[%s3395_s10 + $0x2e8] sm:$0xff] %v2227_v11  ;;  %v2713_v12 = vpop.f32.mrb[32].mxu0  ;;  %v2777_v13 = vpop.f32.mrb[32].mxu1 }
 0x18f   : > { %v2040_v14 = vadd.f32 %v2713_v12, %v3384_v8  ;;  %v2104_v15 = vadd.f32 %v2777_v13, %v3384_v8  ;;  %v1229_v16 = vpop.f32.mrb[33].mxu0  ;;  %v1485_v17 = vpop.f32.mrb[33].mxu1 }
 0x190   : > { %v2038_v18 = vadd.f32 %v3384_v8, %v1229_v16  ;;  %v2102_v19 = vadd.f32 %v3384_v8, %v1485_v17  ;;  %v2714_v20 = vpop.f32.mrb[34].mxu0  ;;  %v2778_v21 = vpop.f32.mrb[34].mxu1 }
 0x191   : > { %v2168_v22 = vmax.f32 %v2040_v14, 0.0  ;;  %v2232_v23 = vmax.f32 %v2104_v15, 0.0  ;;  %v2041_v24 = vadd.f32 %v2714_v20, %v3384_v8  ;;  %v2105_v25 = vadd.f32 %v2778_v21, %v3384_v8  ;;  %v1232_v26 = vpop.f32.mrb[35].mxu0  ;;  %v1488_v27 = vpop.f32.mrb[35].mxu1 }
 0x192   : > { %v2166_v28 = vmax.f32 %v2038_v18, 0.0  ;;  %v2230_v29 = vmax.f32 %v2102_v19, 0.0  ;;  %v2039_v30 = vadd.f32 %v3384_v8, %v1232_v26  ;;  %v2103_v31 = vadd.f32 %v3384_v8, %v1488_v27 }
 0x193   : > { %2296 = vst [vmem:[%s3395_s10 + $0x110] sm:$0xff] %v2168_v22  ;;  %2360 = vst [vmem:[%s3395_s10 + $0x310] sm:$0xff] %v2232_v23  ;;  %v2169_v32 = vmax.f32 %v2041_v24, 0.0  ;;  %v2233_v33 = vmax.f32 %v2105_v25, 0.0 }
 0x194   : > { %2294 = vst [vmem:[%s3395_s10 + $0x100] sm:$0xff] %v2166_v28  ;;  %2358 = vst [vmem:[%s3395_s10 + $0x300] sm:$0xff] %v2230_v29  ;;  %v2167_v34 = vmax.f32 %v2039_v30, 0.0  ;;  %v2231_v35 = vmax.f32 %v2103_v31, 0.0 }
 0x195   : > { %2297 = vst [vmem:[%s3395_s10 + $0x118] sm:$0xff] %v2169_v32  ;;  %2361 = vst [vmem:[%s3395_s10 + $0x318] sm:$0xff] %v2233_v33 }
 0x196   : > { %2295 = vst [vmem:[%s3395_s10 + $0x108] sm:$0xff] %v2167_v34  ;;  %2359 = vst [vmem:[%s3395_s10 + $0x308] sm:$0xff] %v2231_v35  ;;  %v2717_v36 = vpop.f32.mrb[36].mxu0  ;;  %v2781_v37 = vpop.f32.mrb[36].mxu1 }
 0x197   : > { %v2044_v38 = vadd.f32 %v2717_v36, %v3384_v8  ;;  %v2108_v39 = vadd.f32 %v2781_v37, %v3384_v8  ;;  %v1245_v40 = vpop.f32.mrb[37].mxu0  ;;  %v1501_v41 = vpop.f32.mrb[37].mxu1 }
 0x198   : > { %v2042_v42 = vadd.f32 %v3384_v8, %v1245_v40  ;;  %v2106_v43 = vadd.f32 %v3384_v8, %v1501_v41  ;;  %v2718_v44 = vpop.f32.mrb[38].mxu0  ;;  %v2782_v45 = vpop.f32.mrb[38].mxu1 }
 0x199   : > { %v2172_v46 = vmax.f32 %v2044_v38, 0.0  ;;  %v2236_v47 = vmax.f32 %v2108_v39, 0.0  ;;  %v2045_v48 = vadd.f32 %v2718_v44, %v3384_v8  ;;  %v2109_v49 = vadd.f32 %v2782_v45, %v3384_v8  ;;  %v1248_v50 = vpop.f32.mrb[39].mxu0  ;;  %v1504_v51 = vpop.f32.mrb[39].mxu1 }
 0x19a   : > { %v2170_v52 = vmax.f32 %v2042_v42, 0.0  ;;  %v2234_v53 = vmax.f32 %v2106_v43, 0.0  ;;  %v2043_v54 = vadd.f32 %v3384_v8, %v1248_v50  ;;  %v2107_v55 = vadd.f32 %v3384_v8, %v1504_v51 }
 0x19b   : > { %2300 = vst [vmem:[%s3395_s10 + $0x130] sm:$0xff] %v2172_v46  ;;  %2364 = vst [vmem:[%s3395_s10 + $0x330] sm:$0xff] %v2236_v47  ;;  %v2173_v56 = vmax.f32 %v2045_v48, 0.0  ;;  %v2237_v57 = vmax.f32 %v2109_v49, 0.0 }
 0x19c   : > { %2298 = vst [vmem:[%s3395_s10 + $0x120] sm:$0xff] %v2170_v52  ;;  %2362 = vst [vmem:[%s3395_s10 + $0x320] sm:$0xff] %v2234_v53  ;;  %v2171_v58 = vmax.f32 %v2043_v54, 0.0  ;;  %v2235_v59 = vmax.f32 %v2107_v55, 0.0 }
 0x19d   : > { %2301 = vst [vmem:[%s3395_s10 + $0x138] sm:$0xff] %v2173_v56  ;;  %2365 = vst [vmem:[%s3395_s10 + $0x338] sm:$0xff] %v2237_v57 }
 0x19e   : > { %2299 = vst [vmem:[%s3395_s10 + $0x128] sm:$0xff] %v2171_v58  ;;  %2363 = vst [vmem:[%s3395_s10 + $0x328] sm:$0xff] %v2235_v59  ;;  %v2721_v60 = vpop.f32.mrb[40].mxu0  ;;  %v2785_v61 = vpop.f32.mrb[40].mxu1 }
 0x19f   : > { %v2048_v62 = vadd.f32 %v2721_v60, %v3384_v8  ;;  %v2112_v63 = vadd.f32 %v2785_v61, %v3384_v8  ;;  %v1261_v0 = vpop.f32.mrb[41].mxu0  ;;  %v1517_v1 = vpop.f32.mrb[41].mxu1 }
 0x1a0   : > { %v2046_v2 = vadd.f32 %v3384_v8, %v1261_v0  ;;  %v2110_v3 = vadd.f32 %v3384_v8, %v1517_v1  ;;  %v2722_v4 = vpop.f32.mrb[42].mxu0  ;;  %v2786_v5 = vpop.f32.mrb[42].mxu1 }
 0x1a1   : > { %v2176_v6 = vmax.f32 %v2048_v62, 0.0  ;;  %v2240_v7 = vmax.f32 %v2112_v63, 0.0  ;;  %v2049_v9 = vadd.f32 %v2722_v4, %v3384_v8  ;;  %v2113_v10 = vadd.f32 %v2786_v5, %v3384_v8  ;;  %v1264_v11 = vpop.f32.mrb[43].mxu0  ;;  %v1520_v12 = vpop.f32.mrb[43].mxu1 }
 0x1a2   : > { %v2174_v13 = vmax.f32 %v2046_v2, 0.0  ;;  %v2238_v14 = vmax.f32 %v2110_v3, 0.0  ;;  %v2047_v15 = vadd.f32 %v3384_v8, %v1264_v11  ;;  %v2111_v16 = vadd.f32 %v3384_v8, %v1520_v12 }
 0x1a3   : > { %2304 = vst [vmem:[%s3395_s10 + $0x150] sm:$0xff] %v2176_v6  ;;  %2368 = vst [vmem:[%s3395_s10 + $0x350] sm:$0xff] %v2240_v7  ;;  %v2177_v17 = vmax.f32 %v2049_v9, 0.0  ;;  %v2241_v18 = vmax.f32 %v2113_v10, 0.0 }
 0x1a4   : > { %2302 = vst [vmem:[%s3395_s10 + $0x140] sm:$0xff] %v2174_v13  ;;  %2366 = vst [vmem:[%s3395_s10 + $0x340] sm:$0xff] %v2238_v14  ;;  %v2175_v19 = vmax.f32 %v2047_v15, 0.0  ;;  %v2239_v20 = vmax.f32 %v2111_v16, 0.0 }
 0x1a5   : > { %2305 = vst [vmem:[%s3395_s10 + $0x158] sm:$0xff] %v2177_v17  ;;  %2369 = vst [vmem:[%s3395_s10 + $0x358] sm:$0xff] %v2241_v18 }
 0x1a6   : > { %2303 = vst [vmem:[%s3395_s10 + $0x148] sm:$0xff] %v2175_v19  ;;  %2367 = vst [vmem:[%s3395_s10 + $0x348] sm:$0xff] %v2239_v20  ;;  %v2725_v21 = vpop.f32.mrb[44].mxu0  ;;  %v2789_v22 = vpop.f32.mrb[44].mxu1 }
 0x1a7   : > { %v2052_v23 = vadd.f32 %v2725_v21, %v3384_v8  ;;  %v2116_v24 = vadd.f32 %v2789_v22, %v3384_v8  ;;  %v1277_v25 = vpop.f32.mrb[45].mxu0  ;;  %v1533_v26 = vpop.f32.mrb[45].mxu1 }
 0x1a8   : > { %v2050_v27 = vadd.f32 %v3384_v8, %v1277_v25  ;;  %v2114_v28 = vadd.f32 %v3384_v8, %v1533_v26  ;;  %v2726_v29 = vpop.f32.mrb[46].mxu0  ;;  %v2790_v30 = vpop.f32.mrb[46].mxu1 }
 0x1a9   : > { %v2180_v31 = vmax.f32 %v2052_v23, 0.0  ;;  %v2244_v32 = vmax.f32 %v2116_v24, 0.0  ;;  %v2053_v33 = vadd.f32 %v2726_v29, %v3384_v8  ;;  %v2117_v34 = vadd.f32 %v2790_v30, %v3384_v8  ;;  %v1280_v35 = vpop.f32.mrb[47].mxu0  ;;  %v1536_v36 = vpop.f32.mrb[47].mxu1 }
 0x1aa   : > { %v2178_v37 = vmax.f32 %v2050_v27, 0.0  ;;  %v2242_v38 = vmax.f32 %v2114_v28, 0.0  ;;  %v2051_v39 = vadd.f32 %v3384_v8, %v1280_v35  ;;  %v2115_v40 = vadd.f32 %v3384_v8, %v1536_v36 }
 0x1ab   : > { %2308 = vst [vmem:[%s3395_s10 + $0x170] sm:$0xff] %v2180_v31  ;;  %2372 = vst [vmem:[%s3395_s10 + $0x370] sm:$0xff] %v2244_v32  ;;  %v2181_v41 = vmax.f32 %v2053_v33, 0.0  ;;  %v2245_v42 = vmax.f32 %v2117_v34, 0.0 }
 0x1ac   : > { %2306 = vst [vmem:[%s3395_s10 + $0x160] sm:$0xff] %v2178_v37  ;;  %2370 = vst [vmem:[%s3395_s10 + $0x360] sm:$0xff] %v2242_v38  ;;  %v2179_v43 = vmax.f32 %v2051_v39, 0.0  ;;  %v2243_v44 = vmax.f32 %v2115_v40, 0.0 }
 0x1ad   : > { %2309 = vst [vmem:[%s3395_s10 + $0x178] sm:$0xff] %v2181_v41  ;;  %2373 = vst [vmem:[%s3395_s10 + $0x378] sm:$0xff] %v2245_v42 }
 0x1ae   : > { %2307 = vst [vmem:[%s3395_s10 + $0x168] sm:$0xff] %v2179_v43  ;;  %2371 = vst [vmem:[%s3395_s10 + $0x368] sm:$0xff] %v2243_v44  ;;  %v2729_v45 = vpop.f32.mrb[48].mxu0  ;;  %v2793_v46 = vpop.f32.mrb[48].mxu1 }
 0x1af   : > { %v2056_v47 = vadd.f32 %v2729_v45, %v3384_v8  ;;  %v2120_v48 = vadd.f32 %v2793_v46, %v3384_v8  ;;  %v1293_v49 = vpop.f32.mrb[49].mxu0  ;;  %v1549_v50 = vpop.f32.mrb[49].mxu1 }
 0x1b0   : > { %v2054_v51 = vadd.f32 %v3384_v8, %v1293_v49  ;;  %v2118_v52 = vadd.f32 %v3384_v8, %v1549_v50  ;;  %v2730_v53 = vpop.f32.mrb[50].mxu0  ;;  %v2794_v54 = vpop.f32.mrb[50].mxu1 }
 0x1b1   : > { %v2184_v55 = vmax.f32 %v2056_v47, 0.0  ;;  %v2248_v56 = vmax.f32 %v2120_v48, 0.0  ;;  %v2057_v57 = vadd.f32 %v2730_v53, %v3384_v8  ;;  %v2121_v58 = vadd.f32 %v2794_v54, %v3384_v8  ;;  %v1296_v59 = vpop.f32.mrb[51].mxu0  ;;  %v1552_v60 = vpop.f32.mrb[51].mxu1 }
 0x1b2   : > { %v2182_v61 = vmax.f32 %v2054_v51, 0.0  ;;  %v2246_v62 = vmax.f32 %v2118_v52, 0.0  ;;  %v2055_v63 = vadd.f32 %v3384_v8, %v1296_v59  ;;  %v2119_v0 = vadd.f32 %v3384_v8, %v1552_v60 }
 0x1b3   : > { %2312 = vst [vmem:[%s3395_s10 + $0x190] sm:$0xff] %v2184_v55  ;;  %2376 = vst [vmem:[%s3395_s10 + $0x390] sm:$0xff] %v2248_v56  ;;  %v2185_v1 = vmax.f32 %v2057_v57, 0.0  ;;  %v2249_v2 = vmax.f32 %v2121_v58, 0.0 }
 0x1b4   : > { %2310 = vst [vmem:[%s3395_s10 + $0x180] sm:$0xff] %v2182_v61  ;;  %2374 = vst [vmem:[%s3395_s10 + $0x380] sm:$0xff] %v2246_v62  ;;  %v2183_v3 = vmax.f32 %v2055_v63, 0.0  ;;  %v2247_v4 = vmax.f32 %v2119_v0, 0.0 }
 0x1b5   : > { %2313 = vst [vmem:[%s3395_s10 + $0x198] sm:$0xff] %v2185_v1  ;;  %2377 = vst [vmem:[%s3395_s10 + $0x398] sm:$0xff] %v2249_v2 }
 0x1b6   : > { %2311 = vst [vmem:[%s3395_s10 + $0x188] sm:$0xff] %v2183_v3  ;;  %2375 = vst [vmem:[%s3395_s10 + $0x388] sm:$0xff] %v2247_v4  ;;  %v2733_v5 = vpop.f32.mrb[52].mxu0  ;;  %v2797_v6 = vpop.f32.mrb[52].mxu1 }
 0x1b7   : > { %v2060_v7 = vadd.f32 %v2733_v5, %v3384_v8  ;;  %v2124_v9 = vadd.f32 %v2797_v6, %v3384_v8  ;;  %v1309_v10 = vpop.f32.mrb[53].mxu0  ;;  %v1565_v11 = vpop.f32.mrb[53].mxu1 }
 0x1b8   : > { %v2058_v12 = vadd.f32 %v3384_v8, %v1309_v10  ;;  %v2122_v13 = vadd.f32 %v3384_v8, %v1565_v11  ;;  %v2734_v14 = vpop.f32.mrb[54].mxu0  ;;  %v2798_v15 = vpop.f32.mrb[54].mxu1 }
 0x1b9   : > { %v2188_v16 = vmax.f32 %v2060_v7, 0.0  ;;  %v2252_v17 = vmax.f32 %v2124_v9, 0.0  ;;  %v2061_v18 = vadd.f32 %v2734_v14, %v3384_v8  ;;  %v2125_v19 = vadd.f32 %v2798_v15, %v3384_v8  ;;  %v1312_v20 = vpop.f32.mrb[55].mxu0  ;;  %v1568_v21 = vpop.f32.mrb[55].mxu1 }
 0x1ba   : > { %v2186_v22 = vmax.f32 %v2058_v12, 0.0  ;;  %v2250_v23 = vmax.f32 %v2122_v13, 0.0  ;;  %v2059_v24 = vadd.f32 %v3384_v8, %v1312_v20  ;;  %v2123_v25 = vadd.f32 %v3384_v8, %v1568_v21 }
 0x1bb   : > { %2316 = vst [vmem:[%s3395_s10 + $0x1b0] sm:$0xff] %v2188_v16  ;;  %2380 = vst [vmem:[%s3395_s10 + $0x3b0] sm:$0xff] %v2252_v17  ;;  %v2189_v26 = vmax.f32 %v2061_v18, 0.0  ;;  %v2253_v27 = vmax.f32 %v2125_v19, 0.0 }
 0x1bc   : > { %2314 = vst [vmem:[%s3395_s10 + $0x1a0] sm:$0xff] %v2186_v22  ;;  %2378 = vst [vmem:[%s3395_s10 + $0x3a0] sm:$0xff] %v2250_v23  ;;  %v2187_v28 = vmax.f32 %v2059_v24, 0.0  ;;  %v2251_v29 = vmax.f32 %v2123_v25, 0.0 }
 0x1bd   : > { %2317 = vst [vmem:[%s3395_s10 + $0x1b8] sm:$0xff] %v2189_v26  ;;  %2381 = vst [vmem:[%s3395_s10 + $0x3b8] sm:$0xff] %v2253_v27 }
 0x1be   : > { %2315 = vst [vmem:[%s3395_s10 + $0x1a8] sm:$0xff] %v2187_v28  ;;  %2379 = vst [vmem:[%s3395_s10 + $0x3a8] sm:$0xff] %v2251_v29  ;;  %v2737_v30 = vpop.f32.mrb[56].mxu0  ;;  %v2801_v31 = vpop.f32.mrb[56].mxu1 }
 0x1bf   : > { %v2064_v32 = vadd.f32 %v2737_v30, %v3384_v8  ;;  %v2128_v33 = vadd.f32 %v2801_v31, %v3384_v8  ;;  %v1325_v34 = vpop.f32.mrb[57].mxu0  ;;  %v1581_v35 = vpop.f32.mrb[57].mxu1 }
 0x1c0   : > { %v2062_v36 = vadd.f32 %v3384_v8, %v1325_v34  ;;  %v2126_v37 = vadd.f32 %v3384_v8, %v1581_v35  ;;  %v2738_v38 = vpop.f32.mrb[58].mxu0  ;;  %v2802_v39 = vpop.f32.mrb[58].mxu1 }
 0x1c1   : > { %v2192_v40 = vmax.f32 %v2064_v32, 0.0  ;;  %v2256_v41 = vmax.f32 %v2128_v33, 0.0  ;;  %v2065_v42 = vadd.f32 %v2738_v38, %v3384_v8  ;;  %v2129_v43 = vadd.f32 %v2802_v39, %v3384_v8  ;;  %v1328_v44 = vpop.f32.mrb[59].mxu0  ;;  %v1584_v45 = vpop.f32.mrb[59].mxu1 }
 0x1c2   : > { %v2190_v46 = vmax.f32 %v2062_v36, 0.0  ;;  %v2254_v47 = vmax.f32 %v2126_v37, 0.0  ;;  %v2063_v48 = vadd.f32 %v3384_v8, %v1328_v44  ;;  %v2127_v49 = vadd.f32 %v3384_v8, %v1584_v45 }
 0x1c3   : > { %2320 = vst [vmem:[%s3395_s10 + $0x1d0] sm:$0xff] %v2192_v40  ;;  %2384 = vst [vmem:[%s3395_s10 + $0x3d0] sm:$0xff] %v2256_v41  ;;  %v2193_v50 = vmax.f32 %v2065_v42, 0.0  ;;  %v2257_v51 = vmax.f32 %v2129_v43, 0.0 }
 0x1c4   : > { %2318 = vst [vmem:[%s3395_s10 + $0x1c0] sm:$0xff] %v2190_v46  ;;  %2382 = vst [vmem:[%s3395_s10 + $0x3c0] sm:$0xff] %v2254_v47  ;;  %v2191_v52 = vmax.f32 %v2063_v48, 0.0  ;;  %v2255_v53 = vmax.f32 %v2127_v49, 0.0 }
 0x1c5   : > { %2321 = vst [vmem:[%s3395_s10 + $0x1d8] sm:$0xff] %v2193_v50  ;;  %2385 = vst [vmem:[%s3395_s10 + $0x3d8] sm:$0xff] %v2257_v51 }
 0x1c6   : > { %2319 = vst [vmem:[%s3395_s10 + $0x1c8] sm:$0xff] %v2191_v52  ;;  %2383 = vst [vmem:[%s3395_s10 + $0x3c8] sm:$0xff] %v2255_v53  ;;  %v2741_v54 = vpop.f32.mrb[60].mxu0  ;;  %v2805_v55 = vpop.f32.mrb[60].mxu1 }
 0x1c7   : > { %v2068_v56 = vadd.f32 %v2741_v54, %v3384_v8  ;;  %v2132_v57 = vadd.f32 %v2805_v55, %v3384_v8  ;;  %v1341_v58 = vpop.f32.mrb[61].mxu0  ;;  %v1597_v59 = vpop.f32.mrb[61].mxu1 }
 0x1c8   : > { %v2066_v60 = vadd.f32 %v3384_v8, %v1341_v58  ;;  %v2130_v61 = vadd.f32 %v3384_v8, %v1597_v59  ;;  %v2742_v62 = vpop.f32.mrb[62].mxu0  ;;  %v2806_v63 = vpop.f32.mrb[62].mxu1 }
 0x1c9   : > { %v2196_v0 = vmax.f32 %v2068_v56, 0.0  ;;  %v2260_v1 = vmax.f32 %v2132_v57, 0.0  ;;  %v2069_v2 = vadd.f32 %v2742_v62, %v3384_v8  ;;  %v2133_v3 = vadd.f32 %v2806_v63, %v3384_v8  ;;  %v1344_v4 = vpop.f32.mrb[63].mxu0  ;;  %v1600_v5 = vpop.f32.mrb[63].mxu1 }
 0x1ca   : > { %v2194_v6 = vmax.f32 %v2066_v60, 0.0  ;;  %v2258_v7 = vmax.f32 %v2130_v61, 0.0  ;;  %v2067_v9 = vadd.f32 %v3384_v8, %v1344_v4  ;;  %v2131_v10 = vadd.f32 %v3384_v8, %v1600_v5 }
 0x1cb   : > { %2324 = vst [vmem:[%s3395_s10 + $0x1f0] sm:$0xff] %v2196_v0  ;;  %2388 = vst [vmem:[%s3395_s10 + $0x3f0] sm:$0xff] %v2260_v1  ;;  %v2197_v11 = vmax.f32 %v2069_v2, 0.0  ;;  %v2261_v12 = vmax.f32 %v2133_v3, 0.0 }
 0x1cc   : > { %2322 = vst [vmem:[%s3395_s10 + $0x1e0] sm:$0xff] %v2194_v6  ;;  %2386 = vst [vmem:[%s3395_s10 + $0x3e0] sm:$0xff] %v2258_v7  ;;  %v2195_v13 = vmax.f32 %v2067_v9, 0.0  ;;  %v2259_v14 = vmax.f32 %v2131_v10, 0.0 }
 0x1cd   : > { %2325 = vst [vmem:[%s3395_s10 + $0x1f8] sm:$0xff] %v2197_v11  ;;  %2389 = vst [vmem:[%s3395_s10 + $0x3f8] sm:$0xff] %v2261_v12 }
 0x1ce   : > { %2323 = vst [vmem:[%s3395_s10 + $0x1e8] sm:$0xff] %v2195_v13  ;;  %2387 = vst [vmem:[%s3395_s10 + $0x3e8] sm:$0xff] %v2259_v14 }
 0x1cf   : > { %3043 = shalt.err (!%p3040_p5)
}
 0x1d0   : > { %s3044_s29 = scalar_lea.hbm %s3644_s19, 16384  ;;  %s3048_s20 = scalar_lea.hbm %s3704_s3, 32768 }
 0x1d1   : > { %p3045_p9 = scmp.ne.s32.totalorder %s3644_s19, %s3044_s29  ;;  %p3049_p3 = scmp.lt.u32.totalorder %s3644_s19, %s3704_s3 }
 0x1d2   : > { %p3050_p7 = scmp.lt.u32.totalorder %s3048_s20, %s3044_s29  ;;  %p3052_p4 = scmp.lt.u32.totalorder %s3044_s29, %s3644_s19 }
 0x1d3   : > { %p3046_p1 = pnand %p3045_p9, %p3244_p10 }
 0x1d4   : > { %p3051_p13 = por %p3050_p7, %p3049_p3 }
 0x1d5   : > { %p3047_p2 = pneg %p3046_p1 }
 0x1d6   : > { %p3053_p6 = por %p3052_p4, %p3051_p13 }
 0x1d8   : > { %p3054_p8 = pnand %p3053_p6, %p3047_p2 }
 0x1da   : > { %3057 = shalt.err (!%p3054_p8)
}
 0x1db   : > { %s3123_s10 = smov 128   ;;  %s3124_s11 = smov 8  }
 0x1dc   : > { %2829 = dma.vmem_to_hbm [thread:$0]  (%p3244_p10), %s3646_s9, 16384, %s3644_s19, %s2391_s25, %s3123_s10, %s3123_s10, %s3124_s11  }
 0x1dd PF: > { %s2419_s15 = sand.u32 1, %s3096_s12   ;;  %p3722_p12 = scmp.ne.s32.totalorder %s3712_s23, 0 }
 0x1de   : > { %p3723_p11 = scmp.ge.s32.totalorder %s3116_s17, 2  ;;  %s2420_s18 = scalar_lea.sflag [#allocation5], %s2419_s15 }
 0x1e0   : > { %p2840_p0 = pnand %p3723_p11, %p3722_p12 }
 0x1e2   : > { %3091 = dma.done.wait (!%p2840_p0), %s2420_s18, 16384  }
 0x1e3   : > { %3093 = vsyncadd (!%p2840_p0), %s2420_s18, 4294950912  ;;  %s20_s17 = sadd.s32 1, %s3116_s17   ;;  %s3724_s12 = smov %s3100_s13 }
 0x1e4   : > { %p17_p5 = scmp.ge.s32.totalorder %s20_s17, 4   ;;  %s3725_s13 = smov %s3104_s14 }
 0x1e5   : > { %s3726_s14 = smov %s3253_s5  ;;  %s3727_s15 = smov %s3112_s16 }
 0x1e6   : > { %s3728_s16 = smov %s3730_s28  ;;  %19 = sbr.rel (!%p17_p5) target bundleno = 7 (0x7), region = 90 }
 0x1ed   :  { %2425 = vsyncpa [#allocation4], 1 }
 0x1ee   :  { %2427 = vsyncpa [#allocation4 + $0x1], 1 }
 0x1ef   :  { %2428 = vsyncpa [#allocation7], 1 }
 0x1f0   :  { %2429 = vsyncpa [#allocation5], 1 }
 0x1f1   :  { %2431 = vsyncpa [#allocation5 + $0x1], 1 }

</bundles_post_ra>
